<compile_context>
chip_gen: v5e
topology: v5e:2x2
jax: 0.10.0
libtpu: 0.0.40
codegen_flags: <defaults>
</compile_context>

<pallas_src>
import functools
import math

import jax
import jax.numpy as jnp
from jax.experimental import pallas as pl
from jax.experimental.pallas import tpu as pltpu


# ----------------------------- Pallas kernel --------------------------------

def encoder_stack_kernel(x_ref, bias_ref,
                         wqkv_ref,
                         wfc_ref, bfc_ref,
                         g1_ref, be1_ref,
                         w1_ref, b1_ref, w2_ref, b2_ref,
                         g2_ref, be2_ref,
                         out_ref,
                         *, num_layers, heads, head_dim, embed_size):
    # One batch element per grid step; all layers fused inside the kernel.
    x = x_ref[0].astype(jnp.float32)     # (S, E)
    bias = bias_ref[0]                   # (S, S) additive bias, pre-scaled
    E = embed_size

    for l in range(num_layers):          # static unroll over layers
        # --- multi-head self-attention ----------------------------------
        # Single fused QKV matmul (block-diagonal per-head weights expanded
        # in the wrapper; Q weights already carry the 1/sqrt(E) scale).
        qkv = jnp.dot(x, wqkv_ref[l], preferred_element_type=jnp.float32)  # (S,3E)
        q = qkv[:, 0 * E:1 * E]
        k = qkv[:, 1 * E:2 * E]
        v = qkv[:, 2 * E:3 * E]

        head_outs = []
        for h in range(heads):
            lo = h * head_dim
            hi = lo + head_dim
            qh = q[:, lo:hi]                                            # (S,D)
            kh = k[:, lo:hi]
            vh = v[:, lo:hi]
            logits = (jnp.dot(qh, kh.T, preferred_element_type=jnp.float32)
                      + bias)                                           # (S,S)
            logits = logits - jnp.max(logits, axis=-1, keepdims=True)
            p = jnp.exp(logits)
            p = p * pl.reciprocal(jnp.sum(p, axis=-1, keepdims=True),
                                  approx=True)
            head_outs.append(jnp.dot(p, vh,
                                     preferred_element_type=jnp.float32))
        # Register-level concat (no lane-narrow VMEM scratch stores).
        attn_cat = jnp.concatenate(head_outs, axis=-1)                  # (S,E)

        attn_out = (jnp.dot(attn_cat, wfc_ref[l],
                            preferred_element_type=jnp.float32) + bfc_ref[l])

        # --- residual + LayerNorm 1 (dropout is identity in eval) --------
        y = attn_out + x
        mu = jnp.mean(y, axis=-1, keepdims=True)
        var = jnp.mean((y - mu) * (y - mu), axis=-1, keepdims=True)
        x1 = (y - mu) * jax.lax.rsqrt(var + 1e-5) * g1_ref[l] + be1_ref[l]

        # --- feed-forward: Linear -> ReLU -> Linear ----------------------
        h1 = (jnp.dot(x1, w1_ref[l], preferred_element_type=jnp.float32)
              + b1_ref[l])
        h1 = jnp.maximum(h1, 0.0)
        ff = (jnp.dot(h1, w2_ref[l], preferred_element_type=jnp.float32)
              + b2_ref[l])

        # --- residual + LayerNorm 2 --------------------------------------
        y2 = ff + x1
        mu2 = jnp.mean(y2, axis=-1, keepdims=True)
        var2 = jnp.mean((y2 - mu2) * (y2 - mu2), axis=-1, keepdims=True)
        x = (y2 - mu2) * jax.lax.rsqrt(var2 + 1e-5) * g2_ref[l] + be2_ref[l]

    out_ref[0] = x.astype(out_ref.dtype)


# ----------------------------- wrapper ---------------------------------------

def _block_diag(w, heads):
    """Expand a shared (D, D) per-head weight to block-diagonal (H*D, H*D)."""
    d = w.shape[0]
    eye = jnp.eye(heads, dtype=w.dtype)
    return jnp.einsum("ij,kl->ikjl", eye, w).reshape(heads * d, heads * d)


def encoder_stack(x_emb, mask, params, *, heads):
    N, S, E = x_emb.shape
    layers = params["layers"]
    L = len(layers)
    D = E // heads
    F = layers[0]["w1"].shape[1]
    inv_scale = 1.0 / math.sqrt(float(E))

    stack = lambda name: jnp.stack([lyr[name] for lyr in layers], axis=0)

    # One-time weight transforms (plain JAX, outside the kernel):
    #   * expand shared per-head (D,D) weights to block-diagonal (E,E),
    #   * fold the 1/sqrt(E) attention scale into the Q weights,
    #   * fuse Q/K/V into a single (E, 3E) matrix per layer.
    wqkv = jnp.stack([
        jnp.concatenate([_block_diag(lyr["wq"], heads) * inv_scale,
                         _block_diag(lyr["wk"], heads),
                         _block_diag(lyr["wv"], heads)], axis=-1)
        for lyr in layers], axis=0)                                   # (L,E,3E)

    # Additive attention-mask bias, pre-scaled, computed once in the wrapper.
    bias = jnp.where(mask == 0,
                     jnp.float32(-1e20) * jnp.float32(inv_scale),
                     jnp.float32(0.0))

    kernel = functools.partial(encoder_stack_kernel, num_layers=L,
                               heads=heads, head_dim=D, embed_size=E)

    def full(shape):
        # Constant index_map -> block stays resident across the grid.
        return pl.BlockSpec(shape, lambda n: (0,) * len(shape))

    return pl.pallas_call(
        kernel,
        out_shape=jax.ShapeDtypeStruct((N, S, E), jnp.float32),
        grid_spec=pltpu.PrefetchScalarGridSpec(
            num_scalar_prefetch=0,
            grid=(N,),
            in_specs=[
                pl.BlockSpec((1, S, E), lambda n: (n, 0, 0)),   # x
                pl.BlockSpec((1, S, S), lambda n: (n, 0, 0)),   # mask bias
                full((L, E, 3 * E)),   # fused QKV (block-diagonal, Q scaled)
                full((L, E, E)),       # wfc
                full((L, 1, E)),       # bfc
                full((L, 1, E)),       # ln1 gamma
                full((L, 1, E)),       # ln1 beta
                full((L, E, F)),       # w1
                full((L, 1, F)),       # b1
                full((L, F, E)),       # w2
                full((L, 1, E)),       # b2
                full((L, 1, E)),       # ln2 gamma
                full((L, 1, E)),       # ln2 beta
            ],
            out_specs=pl.BlockSpec((1, S, E), lambda n: (n, 0, 0)),
        ),
        compiler_params=pltpu.CompilerParams(
            dimension_semantics=("parallel",),     # batch -> both TCs on v7x
            vmem_limit_bytes=32 * 1024 * 1024),
    )(x_emb, bias,
      wqkv,
      stack("wfc"), stack("bfc"),
      stack("g1"), stack("be1"),
      stack("w1"), stack("b1"), stack("w2"), stack("b2"),
      stack("g2"), stack("be2"))


def encoder_forward(tokens, mask, params, *, heads):
    N, S = tokens.shape
    positions = jnp.arange(S)
    # Embedding gathers are glue (plain JAX).
    out = params["word_emb"][tokens] + params["pos_emb"][positions][None, :, :]
    # TODO(synk): nn.Dropout is identity in eval mode; not implemented as a kernel.
    return encoder_stack(out, mask, params, heads=heads)


# ------------------------- deterministic param init --------------------------

def init_params(key, vocab, E, num_layer, heads, forward_expansion, max_len):
    D = E // heads
    F = forward_expansion * E
    keys = jax.random.split(key, 2 + num_layer)
    f32 = jnp.float32
    params = {
        "word_emb": (jax.random.normal(keys[0], (vocab, E)) * 0.02).astype(f32),
        "pos_emb": (jax.random.normal(keys[1], (max_len, E)) * 0.02).astype(f32),
        "layers": [],
    }
    for l in range(num_layer):
        lk = jax.random.split(keys[2 + l], 6)
        layer = {
            "wq": (jax.random.normal(lk[0], (D, D)) / math.sqrt(D)).astype(f32),
            "wk": (jax.random.normal(lk[1], (D, D)) / math.sqrt(D)).astype(f32),
            "wv": (jax.random.normal(lk[2], (D, D)) / math.sqrt(D)).astype(f32),
            "wfc": (jax.random.normal(lk[3], (E, E)) / math.sqrt(E)).astype(f32),
            "bfc": jnp.zeros((1, E), f32),
            "g1": jnp.ones((1, E), f32),
            "be1": jnp.zeros((1, E), f32),
            "w1": (jax.random.normal(lk[4], (E, F)) / math.sqrt(E)).astype(f32),
            "b1": jnp.zeros((1, F), f32),
            "w2": (jax.random.normal(lk[5], (F, E)) / math.sqrt(F)).astype(f32),
            "b2": jnp.zeros((1, E), f32),
            "g2": jnp.ones((1, E), f32),
            "be2": jnp.zeros((1, E), f32),
        }
        params["layers"].append(layer)
    return params


# ----------------------------- pure-JAX reference ----------------------------

def _layernorm_ref(y, g, b):
    mu = jnp.mean(y, axis=-1, keepdims=True)
    var = jnp.mean((y - mu) ** 2, axis=-1, keepdims=True)
    return (y - mu) / jnp.sqrt(var + 1e-5) * g + b


def block_ref(x, mask, p, heads):
    N, S, E = x.shape
    D = E // heads
    hi_p = jax.lax.Precision.HIGHEST
    outs = []
    for h in range(heads):
        xh = x[:, :, h * D:(h + 1) * D]
        q = jnp.einsum("nsd,de->nse", xh, p["wq"], precision=hi_p)
        k = jnp.einsum("nsd,de->nse", xh, p["wk"], precision=hi_p)
        v = jnp.einsum("nsd,de->nse", xh, p["wv"], precision=hi_p)
        energy = jnp.einsum("nqd,nkd->nqk", q, k, precision=hi_p)
        energy = jnp.where(mask == 0, -1e20, energy)
        attn = jax.nn.softmax(energy / math.sqrt(E), axis=-1)
        outs.append(jnp.einsum("nqk,nkd->nqd", attn, v, precision=hi_p))
    cat = jnp.concatenate(outs, axis=-1)
    attn_out = jnp.einsum("nse,ef->nsf", cat, p["wfc"], precision=hi_p) + p["bfc"]
    x1 = _layernorm_ref(attn_out + x, p["g1"], p["be1"])
    h1 = jax.nn.relu(jnp.einsum("nse,ef->nsf", x1, p["w1"], precision=hi_p) + p["b1"])
    ff = jnp.einsum("nsf,fe->nse", h1, p["w2"], precision=hi_p) + p["b2"]
    return _layernorm_ref(ff + x1, p["g2"], p["be2"])


def encoder_ref(tokens, mask, params, *, heads):
    N, S = tokens.shape
    out = params["word_emb"][tokens] + params["pos_emb"][jnp.arange(S)][None]
    for layer in params["layers"]:
        out = block_ref(out, mask, layer, heads)
    return out


# ----------------------------------- main ------------------------------------

if __name__ == "__main__":
    # Small, module-consistent sizes.
    src_vocab_size = 50
    embed_size = 32
    num_layer = 2
    heads = 4
    forward_expansion = 2
    max_len = 16
    N, seq_len = 2, 8

    key = jax.random.PRNGKey(0)
    pkey, tkey = jax.random.split(key)
    params = init_params(pkey, src_vocab_size, embed_size, num_layer,
                         heads, forward_expansion, max_len)

    tokens = jax.random.randint(tkey, (N, seq_len), 0, src_vocab_size,
                                dtype=jnp.int32)
    # Padding-style mask: (N, S, S); zeros mark masked keys (last 2 of batch 1).
    mask = jnp.ones((N, seq_len, seq_len), jnp.float32)
    mask = mask.at[1, :, seq_len - 2:].set(0.0)

    out = encoder_forward(tokens, mask, params, heads=heads)
    out = jax.block_until_ready(out)

    ref = encoder_ref(tokens, mask, params, heads=heads)
    assert out.shape == (N, seq_len, embed_size)
    assert jnp.allclose(out, ref, atol=2e-2, rtol=2e-2), \
        f"max abs diff {jnp.max(jnp.abs(out - ref))}"

    print("KERNEL_OK")
</pallas_src>

<mosaic_0001>
module attributes {stable_mosaic.version = 11 : i64} {
  func.func @encoder_stack_kernel(%arg0: i32, %arg1: memref<1x8x32xf32, #tpu.memory_space<vmem>>, %arg2: memref<1x8x8xf32, #tpu.memory_space<vmem>>, %arg3: memref<2x32x96xf32, #tpu.memory_space<vmem>>, %arg4: memref<2x32x32xf32, #tpu.memory_space<vmem>>, %arg5: memref<2x1x32xf32, #tpu.memory_space<vmem>>, %arg6: memref<2x1x32xf32, #tpu.memory_space<vmem>>, %arg7: memref<2x1x32xf32, #tpu.memory_space<vmem>>, %arg8: memref<2x32x64xf32, #tpu.memory_space<vmem>>, %arg9: memref<2x1x64xf32, #tpu.memory_space<vmem>>, %arg10: memref<2x64x32xf32, #tpu.memory_space<vmem>>, %arg11: memref<2x1x32xf32, #tpu.memory_space<vmem>>, %arg12: memref<2x1x32xf32, #tpu.memory_space<vmem>>, %arg13: memref<2x1x32xf32, #tpu.memory_space<vmem>>, %arg14: memref<1x8x32xf32, #tpu.memory_space<vmem>>) attributes {dimension_semantics = [#tpu.dimension_semantics<parallel>], iteration_bounds = array<i64: 2>, scalar_prefetch = 0 : i64, scratch_operands = 0 : i64, tpu.core_type = #tpu.core_type<tc>, window_params = [{transform_indices = @transform_0, window_bounds = array<i64: 1, 8, 32>}, {transform_indices = @transform_1, window_bounds = array<i64: 1, 8, 8>}, {pipeline_mode = #tpu.pipeline_mode<synchronous>, transform_indices = @transform_2, window_bounds = array<i64: 2, 32, 96>}, {pipeline_mode = #tpu.pipeline_mode<synchronous>, transform_indices = @transform_3, window_bounds = array<i64: 2, 32, 32>}, {pipeline_mode = #tpu.pipeline_mode<synchronous>, transform_indices = @transform_4, window_bounds = array<i64: 2, 1, 32>}, {pipeline_mode = #tpu.pipeline_mode<synchronous>, transform_indices = @transform_5, window_bounds = array<i64: 2, 1, 32>}, {pipeline_mode = #tpu.pipeline_mode<synchronous>, transform_indices = @transform_6, window_bounds = array<i64: 2, 1, 32>}, {pipeline_mode = #tpu.pipeline_mode<synchronous>, transform_indices = @transform_7, window_bounds = array<i64: 2, 32, 64>}, {pipeline_mode = #tpu.pipeline_mode<synchronous>, transform_indices = @transform_8, window_bounds = array<i64: 2, 1, 64>}, {pipeline_mode = #tpu.pipeline_mode<synchronous>, transform_indices = @transform_9, window_bounds = array<i64: 2, 64, 32>}, {pipeline_mode = #tpu.pipeline_mode<synchronous>, transform_indices = @transform_10, window_bounds = array<i64: 2, 1, 32>}, {pipeline_mode = #tpu.pipeline_mode<synchronous>, transform_indices = @transform_11, window_bounds = array<i64: 2, 1, 32>}, {pipeline_mode = #tpu.pipeline_mode<synchronous>, transform_indices = @transform_12, window_bounds = array<i64: 2, 1, 32>}, {transform_indices = @transform_13, window_bounds = array<i64: 1, 8, 32>}]} {
    %c0 = arith.constant 0 : index
    %c0_0 = arith.constant 0 : index
    %c0_1 = arith.constant 0 : index
    %0 = vector.load %arg1[%c0, %c0_0, %c0_1] : memref<1x8x32xf32, #tpu.memory_space<vmem>>, vector<1x8x32xf32>
    %1 = vector.shape_cast %0 : vector<1x8x32xf32> to vector<8x32xf32>
    %c0_2 = arith.constant 0 : index
    %c0_3 = arith.constant 0 : index
    %c0_4 = arith.constant 0 : index
    %2 = vector.load %arg2[%c0_2, %c0_3, %c0_4] : memref<1x8x8xf32, #tpu.memory_space<vmem>>, vector<1x8x8xf32>
    %3 = vector.shape_cast %2 : vector<1x8x8xf32> to vector<8x8xf32>
    %c0_5 = arith.constant 0 : index
    %c0_6 = arith.constant 0 : index
    %c0_7 = arith.constant 0 : index
    %4 = vector.load %arg3[%c0_5, %c0_6, %c0_7] : memref<2x32x96xf32, #tpu.memory_space<vmem>>, vector<1x32x96xf32>
    %5 = vector.shape_cast %4 : vector<1x32x96xf32> to vector<32x96xf32>
    %cst = arith.constant dense<0.000000e+00> : vector<8x96xf32>
    %6 = tpu.matmul %1, %5, %cst {dimension_numbers = #tpu.dot_dimension_numbers<[1], [0], [0], [1], [0, 0, 1, 1], [], []>} : vector<8x32xf32>, vector<32x96xf32>, vector<8x96xf32> -> vector<8x96xf32>
    %7 = vector.extract_strided_slice %6 {offsets = [0, 0], sizes = [8, 32], strides = [1, 1]} : vector<8x96xf32> to vector<8x32xf32>
    %8 = vector.extract_strided_slice %6 {offsets = [0, 32], sizes = [8, 32], strides = [1, 1]} : vector<8x96xf32> to vector<8x32xf32>
    %9 = vector.extract_strided_slice %6 {offsets = [0, 64], sizes = [8, 32], strides = [1, 1]} : vector<8x96xf32> to vector<8x32xf32>
    %10 = vector.extract_strided_slice %7 {offsets = [0, 0], sizes = [8, 8], strides = [1, 1]} : vector<8x32xf32> to vector<8x8xf32>
    %11 = vector.extract_strided_slice %8 {offsets = [0, 0], sizes = [8, 8], strides = [1, 1]} : vector<8x32xf32> to vector<8x8xf32>
    %12 = vector.extract_strided_slice %9 {offsets = [0, 0], sizes = [8, 8], strides = [1, 1]} : vector<8x32xf32> to vector<8x8xf32>
    %13 = tpu.transpose %11, [1, 0] : vector<8x8xf32> -> vector<8x8xf32>
    %cst_8 = arith.constant dense<0.000000e+00> : vector<8x8xf32>
    %14 = tpu.matmul %10, %13, %cst_8 {dimension_numbers = #tpu.dot_dimension_numbers<[1], [0], [0], [1], [0, 0, 1, 1], [], []>} : vector<8x8xf32>, vector<8x8xf32>, vector<8x8xf32> -> vector<8x8xf32>
    %15 = arith.addf %14, %3 : vector<8x8xf32>
    %cst_9 = arith.constant dense<0xFF800000> : vector<8xf32>
    %16 = vector.multi_reduction <maximumf>, %15, %cst_9 [1] : vector<8x8xf32> to vector<8xf32>
    %17 = vector.shape_cast %16 : vector<8xf32> to vector<8x1xf32>
    %18 = vector.broadcast %17 : vector<8x1xf32> to vector<8x8xf32>
    %19 = arith.subf %15, %18 : vector<8x8xf32>
    %20 = math.exp %19 : vector<8x8xf32>
    %cst_10 = arith.constant dense<0.000000e+00> : vector<8xf32>
    %21 = vector.multi_reduction <add>, %20, %cst_10 [1] : vector<8x8xf32> to vector<8xf32>
    %22 = vector.shape_cast %21 : vector<8xf32> to vector<8x1xf32>
    %23 = tpu.reciprocal %22 {approx = true} : vector<8x1xf32> -> vector<8x1xf32>
    %24 = vector.broadcast %23 : vector<8x1xf32> to vector<8x8xf32>
    %25 = arith.mulf %20, %24 : vector<8x8xf32>
    %cst_11 = arith.constant dense<0.000000e+00> : vector<8x8xf32>
    %26 = tpu.matmul %25, %12, %cst_11 {dimension_numbers = #tpu.dot_dimension_numbers<[1], [0], [0], [1], [0, 0, 1, 1], [], []>} : vector<8x8xf32>, vector<8x8xf32>, vector<8x8xf32> -> vector<8x8xf32>
    %27 = vector.extract_strided_slice %7 {offsets = [0, 8], sizes = [8, 8], strides = [1, 1]} : vector<8x32xf32> to vector<8x8xf32>
    %28 = vector.extract_strided_slice %8 {offsets = [0, 8], sizes = [8, 8], strides = [1, 1]} : vector<8x32xf32> to vector<8x8xf32>
    %29 = vector.extract_strided_slice %9 {offsets = [0, 8], sizes = [8, 8], strides = [1, 1]} : vector<8x32xf32> to vector<8x8xf32>
    %30 = tpu.transpose %28, [1, 0] : vector<8x8xf32> -> vector<8x8xf32>
    %cst_12 = arith.constant dense<0.000000e+00> : vector<8x8xf32>
    %31 = tpu.matmul %27, %30, %cst_12 {dimension_numbers = #tpu.dot_dimension_numbers<[1], [0], [0], [1], [0, 0, 1, 1], [], []>} : vector<8x8xf32>, vector<8x8xf32>, vector<8x8xf32> -> vector<8x8xf32>
    %32 = arith.addf %31, %3 : vector<8x8xf32>
    %cst_13 = arith.constant dense<0xFF800000> : vector<8xf32>
    %33 = vector.multi_reduction <maximumf>, %32, %cst_13 [1] : vector<8x8xf32> to vector<8xf32>
    %34 = vector.shape_cast %33 : vector<8xf32> to vector<8x1xf32>
    %35 = vector.broadcast %34 : vector<8x1xf32> to vector<8x8xf32>
    %36 = arith.subf %32, %35 : vector<8x8xf32>
    %37 = math.exp %36 : vector<8x8xf32>
    %cst_14 = arith.constant dense<0.000000e+00> : vector<8xf32>
    %38 = vector.multi_reduction <add>, %37, %cst_14 [1] : vector<8x8xf32> to vector<8xf32>
    %39 = vector.shape_cast %38 : vector<8xf32> to vector<8x1xf32>
    %40 = tpu.reciprocal %39 {approx = true} : vector<8x1xf32> -> vector<8x1xf32>
    %41 = vector.broadcast %40 : vector<8x1xf32> to vector<8x8xf32>
    %42 = arith.mulf %37, %41 : vector<8x8xf32>
    %cst_15 = arith.constant dense<0.000000e+00> : vector<8x8xf32>
    %43 = tpu.matmul %42, %29, %cst_15 {dimension_numbers = #tpu.dot_dimension_numbers<[1], [0], [0], [1], [0, 0, 1, 1], [], []>} : vector<8x8xf32>, vector<8x8xf32>, vector<8x8xf32> -> vector<8x8xf32>
    %44 = vector.extract_strided_slice %7 {offsets = [0, 16], sizes = [8, 8], strides = [1, 1]} : vector<8x32xf32> to vector<8x8xf32>
    %45 = vector.extract_strided_slice %8 {offsets = [0, 16], sizes = [8, 8], strides = [1, 1]} : vector<8x32xf32> to vector<8x8xf32>
    %46 = vector.extract_strided_slice %9 {offsets = [0, 16], sizes = [8, 8], strides = [1, 1]} : vector<8x32xf32> to vector<8x8xf32>
    %47 = tpu.transpose %45, [1, 0] : vector<8x8xf32> -> vector<8x8xf32>
    %cst_16 = arith.constant dense<0.000000e+00> : vector<8x8xf32>
    %48 = tpu.matmul %44, %47, %cst_16 {dimension_numbers = #tpu.dot_dimension_numbers<[1], [0], [0], [1], [0, 0, 1, 1], [], []>} : vector<8x8xf32>, vector<8x8xf32>, vector<8x8xf32> -> vector<8x8xf32>
    %49 = arith.addf %48, %3 : vector<8x8xf32>
    %cst_17 = arith.constant dense<0xFF800000> : vector<8xf32>
    %50 = vector.multi_reduction <maximumf>, %49, %cst_17 [1] : vector<8x8xf32> to vector<8xf32>
    %51 = vector.shape_cast %50 : vector<8xf32> to vector<8x1xf32>
    %52 = vector.broadcast %51 : vector<8x1xf32> to vector<8x8xf32>
    %53 = arith.subf %49, %52 : vector<8x8xf32>
    %54 = math.exp %53 : vector<8x8xf32>
    %cst_18 = arith.constant dense<0.000000e+00> : vector<8xf32>
    %55 = vector.multi_reduction <add>, %54, %cst_18 [1] : vector<8x8xf32> to vector<8xf32>
    %56 = vector.shape_cast %55 : vector<8xf32> to vector<8x1xf32>
    %57 = tpu.reciprocal %56 {approx = true} : vector<8x1xf32> -> vector<8x1xf32>
    %58 = vector.broadcast %57 : vector<8x1xf32> to vector<8x8xf32>
    %59 = arith.mulf %54, %58 : vector<8x8xf32>
    %cst_19 = arith.constant dense<0.000000e+00> : vector<8x8xf32>
    %60 = tpu.matmul %59, %46, %cst_19 {dimension_numbers = #tpu.dot_dimension_numbers<[1], [0], [0], [1], [0, 0, 1, 1], [], []>} : vector<8x8xf32>, vector<8x8xf32>, vector<8x8xf32> -> vector<8x8xf32>
    %61 = vector.extract_strided_slice %7 {offsets = [0, 24], sizes = [8, 8], strides = [1, 1]} : vector<8x32xf32> to vector<8x8xf32>
    %62 = vector.extract_strided_slice %8 {offsets = [0, 24], sizes = [8, 8], strides = [1, 1]} : vector<8x32xf32> to vector<8x8xf32>
    %63 = vector.extract_strided_slice %9 {offsets = [0, 24], sizes = [8, 8], strides = [1, 1]} : vector<8x32xf32> to vector<8x8xf32>
    %64 = tpu.transpose %62, [1, 0] : vector<8x8xf32> -> vector<8x8xf32>
    %cst_20 = arith.constant dense<0.000000e+00> : vector<8x8xf32>
    %65 = tpu.matmul %61, %64, %cst_20 {dimension_numbers = #tpu.dot_dimension_numbers<[1], [0], [0], [1], [0, 0, 1, 1], [], []>} : vector<8x8xf32>, vector<8x8xf32>, vector<8x8xf32> -> vector<8x8xf32>
    %66 = arith.addf %65, %3 : vector<8x8xf32>
    %cst_21 = arith.constant dense<0xFF800000> : vector<8xf32>
    %67 = vector.multi_reduction <maximumf>, %66, %cst_21 [1] : vector<8x8xf32> to vector<8xf32>
    %68 = vector.shape_cast %67 : vector<8xf32> to vector<8x1xf32>
    %69 = vector.broadcast %68 : vector<8x1xf32> to vector<8x8xf32>
    %70 = arith.subf %66, %69 : vector<8x8xf32>
    %71 = math.exp %70 : vector<8x8xf32>
    %cst_22 = arith.constant dense<0.000000e+00> : vector<8xf32>
    %72 = vector.multi_reduction <add>, %71, %cst_22 [1] : vector<8x8xf32> to vector<8xf32>
    %73 = vector.shape_cast %72 : vector<8xf32> to vector<8x1xf32>
    %74 = tpu.reciprocal %73 {approx = true} : vector<8x1xf32> -> vector<8x1xf32>
    %75 = vector.broadcast %74 : vector<8x1xf32> to vector<8x8xf32>
    %76 = arith.mulf %71, %75 : vector<8x8xf32>
    %cst_23 = arith.constant dense<0.000000e+00> : vector<8x8xf32>
    %77 = tpu.matmul %76, %63, %cst_23 {dimension_numbers = #tpu.dot_dimension_numbers<[1], [0], [0], [1], [0, 0, 1, 1], [], []>} : vector<8x8xf32>, vector<8x8xf32>, vector<8x8xf32> -> vector<8x8xf32>
    %78 = tpu.concatenate %26, %43, %60, %77 in 1 : vector<8x8xf32>, vector<8x8xf32>, vector<8x8xf32>, vector<8x8xf32> -> vector<8x32xf32>
    %c0_24 = arith.constant 0 : index
    %c0_25 = arith.constant 0 : index
    %c0_26 = arith.constant 0 : index
    %79 = vector.load %arg4[%c0_24, %c0_25, %c0_26] : memref<2x32x32xf32, #tpu.memory_space<vmem>>, vector<1x32x32xf32>
    %80 = vector.shape_cast %79 : vector<1x32x32xf32> to vector<32x32xf32>
    %cst_27 = arith.constant dense<0.000000e+00> : vector<8x32xf32>
    %81 = tpu.matmul %78, %80, %cst_27 {dimension_numbers = #tpu.dot_dimension_numbers<[1], [0], [0], [1], [0, 0, 1, 1], [], []>} : vector<8x32xf32>, vector<32x32xf32>, vector<8x32xf32> -> vector<8x32xf32>
    %c0_28 = arith.constant 0 : index
    %c0_29 = arith.constant 0 : index
    %c0_30 = arith.constant 0 : index
    %82 = vector.load %arg5[%c0_28, %c0_29, %c0_30] : memref<2x1x32xf32, #tpu.memory_space<vmem>>, vector<1x1x32xf32>
    %83 = vector.shape_cast %82 : vector<1x1x32xf32> to vector<1x32xf32>
    %84 = vector.broadcast %83 : vector<1x32xf32> to vector<8x32xf32>
    %85 = arith.addf %81, %84 : vector<8x32xf32>
    %86 = arith.addf %85, %1 : vector<8x32xf32>
    %cst_31 = arith.constant dense<0.000000e+00> : vector<8xf32>
    %87 = vector.multi_reduction <add>, %86, %cst_31 [1] : vector<8x32xf32> to vector<8xf32>
    %88 = vector.shape_cast %87 : vector<8xf32> to vector<8x1xf32>
    %cst_32 = arith.constant 3.200000e+01 : f32
    %89 = vector.broadcast %cst_32 : f32 to vector<8x1xf32>
    %90 = arith.divf %88, %89 : vector<8x1xf32>
    %91 = vector.broadcast %90 : vector<8x1xf32> to vector<8x32xf32>
    %92 = arith.subf %86, %91 : vector<8x32xf32>
    %93 = vector.broadcast %90 : vector<8x1xf32> to vector<8x32xf32>
    %94 = arith.subf %86, %93 : vector<8x32xf32>
    %95 = arith.mulf %92, %94 : vector<8x32xf32>
    %cst_33 = arith.constant dense<0.000000e+00> : vector<8xf32>
    %96 = vector.multi_reduction <add>, %95, %cst_33 [1] : vector<8x32xf32> to vector<8xf32>
    %97 = vector.shape_cast %96 : vector<8xf32> to vector<8x1xf32>
    %cst_34 = arith.constant 3.200000e+01 : f32
    %98 = vector.broadcast %cst_34 : f32 to vector<8x1xf32>
    %99 = arith.divf %97, %98 : vector<8x1xf32>
    %100 = vector.broadcast %90 : vector<8x1xf32> to vector<8x32xf32>
    %101 = arith.subf %86, %100 : vector<8x32xf32>
    %cst_35 = arith.constant 9.99999974E-6 : f32
    %102 = vector.broadcast %cst_35 : f32 to vector<8x1xf32>
    %103 = arith.addf %99, %102 : vector<8x1xf32>
    %104 = math.rsqrt %103 : vector<8x1xf32>
    %105 = vector.broadcast %104 : vector<8x1xf32> to vector<8x32xf32>
    %106 = arith.mulf %101, %105 : vector<8x32xf32>
    %c0_36 = arith.constant 0 : index
    %c0_37 = arith.constant 0 : index
    %c0_38 = arith.constant 0 : index
    %107 = vector.load %arg6[%c0_36, %c0_37, %c0_38] : memref<2x1x32xf32, #tpu.memory_space<vmem>>, vector<1x1x32xf32>
    %108 = vector.shape_cast %107 : vector<1x1x32xf32> to vector<1x32xf32>
    %109 = vector.broadcast %108 : vector<1x32xf32> to vector<8x32xf32>
    %110 = arith.mulf %106, %109 : vector<8x32xf32>
    %c0_39 = arith.constant 0 : index
    %c0_40 = arith.constant 0 : index
    %c0_41 = arith.constant 0 : index
    %111 = vector.load %arg7[%c0_39, %c0_40, %c0_41] : memref<2x1x32xf32, #tpu.memory_space<vmem>>, vector<1x1x32xf32>
    %112 = vector.shape_cast %111 : vector<1x1x32xf32> to vector<1x32xf32>
    %113 = vector.broadcast %112 : vector<1x32xf32> to vector<8x32xf32>
    %114 = arith.addf %110, %113 : vector<8x32xf32>
    %c0_42 = arith.constant 0 : index
    %c0_43 = arith.constant 0 : index
    %c0_44 = arith.constant 0 : index
    %115 = vector.load %arg8[%c0_42, %c0_43, %c0_44] : memref<2x32x64xf32, #tpu.memory_space<vmem>>, vector<1x32x64xf32>
    %116 = vector.shape_cast %115 : vector<1x32x64xf32> to vector<32x64xf32>
    %cst_45 = arith.constant dense<0.000000e+00> : vector<8x64xf32>
    %117 = tpu.matmul %114, %116, %cst_45 {dimension_numbers = #tpu.dot_dimension_numbers<[1], [0], [0], [1], [0, 0, 1, 1], [], []>} : vector<8x32xf32>, vector<32x64xf32>, vector<8x64xf32> -> vector<8x64xf32>
    %c0_46 = arith.constant 0 : index
    %c0_47 = arith.constant 0 : index
    %c0_48 = arith.constant 0 : index
    %118 = vector.load %arg9[%c0_46, %c0_47, %c0_48] : memref<2x1x64xf32, #tpu.memory_space<vmem>>, vector<1x1x64xf32>
    %119 = vector.shape_cast %118 : vector<1x1x64xf32> to vector<1x64xf32>
    %120 = vector.broadcast %119 : vector<1x64xf32> to vector<8x64xf32>
    %121 = arith.addf %117, %120 : vector<8x64xf32>
    %cst_49 = arith.constant 0.000000e+00 : f32
    %122 = vector.broadcast %cst_49 : f32 to vector<8x64xf32>
    %123 = arith.maximumf %121, %122 : vector<8x64xf32>
    %c0_50 = arith.constant 0 : index
    %c0_51 = arith.constant 0 : index
    %c0_52 = arith.constant 0 : index
    %124 = vector.load %arg10[%c0_50, %c0_51, %c0_52] : memref<2x64x32xf32, #tpu.memory_space<vmem>>, vector<1x64x32xf32>
    %125 = vector.shape_cast %124 : vector<1x64x32xf32> to vector<64x32xf32>
    %cst_53 = arith.constant dense<0.000000e+00> : vector<8x32xf32>
    %126 = tpu.matmul %123, %125, %cst_53 {dimension_numbers = #tpu.dot_dimension_numbers<[1], [0], [0], [1], [0, 0, 1, 1], [], []>} : vector<8x64xf32>, vector<64x32xf32>, vector<8x32xf32> -> vector<8x32xf32>
    %c0_54 = arith.constant 0 : index
    %c0_55 = arith.constant 0 : index
    %c0_56 = arith.constant 0 : index
    %127 = vector.load %arg11[%c0_54, %c0_55, %c0_56] : memref<2x1x32xf32, #tpu.memory_space<vmem>>, vector<1x1x32xf32>
    %128 = vector.shape_cast %127 : vector<1x1x32xf32> to vector<1x32xf32>
    %129 = vector.broadcast %128 : vector<1x32xf32> to vector<8x32xf32>
    %130 = arith.addf %126, %129 : vector<8x32xf32>
    %131 = arith.addf %130, %114 : vector<8x32xf32>
    %cst_57 = arith.constant dense<0.000000e+00> : vector<8xf32>
    %132 = vector.multi_reduction <add>, %131, %cst_57 [1] : vector<8x32xf32> to vector<8xf32>
    %133 = vector.shape_cast %132 : vector<8xf32> to vector<8x1xf32>
    %cst_58 = arith.constant 3.200000e+01 : f32
    %134 = vector.broadcast %cst_58 : f32 to vector<8x1xf32>
    %135 = arith.divf %133, %134 : vector<8x1xf32>
    %136 = vector.broadcast %135 : vector<8x1xf32> to vector<8x32xf32>
    %137 = arith.subf %131, %136 : vector<8x32xf32>
    %138 = vector.broadcast %135 : vector<8x1xf32> to vector<8x32xf32>
    %139 = arith.subf %131, %138 : vector<8x32xf32>
    %140 = arith.mulf %137, %139 : vector<8x32xf32>
    %cst_59 = arith.constant dense<0.000000e+00> : vector<8xf32>
    %141 = vector.multi_reduction <add>, %140, %cst_59 [1] : vector<8x32xf32> to vector<8xf32>
    %142 = vector.shape_cast %141 : vector<8xf32> to vector<8x1xf32>
    %cst_60 = arith.constant 3.200000e+01 : f32
    %143 = vector.broadcast %cst_60 : f32 to vector<8x1xf32>
    %144 = arith.divf %142, %143 : vector<8x1xf32>
    %145 = vector.broadcast %135 : vector<8x1xf32> to vector<8x32xf32>
    %146 = arith.subf %131, %145 : vector<8x32xf32>
    %cst_61 = arith.constant 9.99999974E-6 : f32
    %147 = vector.broadcast %cst_61 : f32 to vector<8x1xf32>
    %148 = arith.addf %144, %147 : vector<8x1xf32>
    %149 = math.rsqrt %148 : vector<8x1xf32>
    %150 = vector.broadcast %149 : vector<8x1xf32> to vector<8x32xf32>
    %151 = arith.mulf %146, %150 : vector<8x32xf32>
    %c0_62 = arith.constant 0 : index
    %c0_63 = arith.constant 0 : index
    %c0_64 = arith.constant 0 : index
    %152 = vector.load %arg12[%c0_62, %c0_63, %c0_64] : memref<2x1x32xf32, #tpu.memory_space<vmem>>, vector<1x1x32xf32>
    %153 = vector.shape_cast %152 : vector<1x1x32xf32> to vector<1x32xf32>
    %154 = vector.broadcast %153 : vector<1x32xf32> to vector<8x32xf32>
    %155 = arith.mulf %151, %154 : vector<8x32xf32>
    %c0_65 = arith.constant 0 : index
    %c0_66 = arith.constant 0 : index
    %c0_67 = arith.constant 0 : index
    %156 = vector.load %arg13[%c0_65, %c0_66, %c0_67] : memref<2x1x32xf32, #tpu.memory_space<vmem>>, vector<1x1x32xf32>
    %157 = vector.shape_cast %156 : vector<1x1x32xf32> to vector<1x32xf32>
    %158 = vector.broadcast %157 : vector<1x32xf32> to vector<8x32xf32>
    %159 = arith.addf %155, %158 : vector<8x32xf32>
    %c1 = arith.constant 1 : index
    %c0_68 = arith.constant 0 : index
    %c0_69 = arith.constant 0 : index
    %160 = vector.load %arg3[%c1, %c0_68, %c0_69] : memref<2x32x96xf32, #tpu.memory_space<vmem>>, vector<1x32x96xf32>
    %161 = vector.shape_cast %160 : vector<1x32x96xf32> to vector<32x96xf32>
    %cst_70 = arith.constant dense<0.000000e+00> : vector<8x96xf32>
    %162 = tpu.matmul %159, %161, %cst_70 {dimension_numbers = #tpu.dot_dimension_numbers<[1], [0], [0], [1], [0, 0, 1, 1], [], []>} : vector<8x32xf32>, vector<32x96xf32>, vector<8x96xf32> -> vector<8x96xf32>
    %163 = vector.extract_strided_slice %162 {offsets = [0, 0], sizes = [8, 32], strides = [1, 1]} : vector<8x96xf32> to vector<8x32xf32>
    %164 = vector.extract_strided_slice %162 {offsets = [0, 32], sizes = [8, 32], strides = [1, 1]} : vector<8x96xf32> to vector<8x32xf32>
    %165 = vector.extract_strided_slice %162 {offsets = [0, 64], sizes = [8, 32], strides = [1, 1]} : vector<8x96xf32> to vector<8x32xf32>
    %166 = vector.extract_strided_slice %163 {offsets = [0, 0], sizes = [8, 8], strides = [1, 1]} : vector<8x32xf32> to vector<8x8xf32>
    %167 = vector.extract_strided_slice %164 {offsets = [0, 0], sizes = [8, 8], strides = [1, 1]} : vector<8x32xf32> to vector<8x8xf32>
    %168 = vector.extract_strided_slice %165 {offsets = [0, 0], sizes = [8, 8], strides = [1, 1]} : vector<8x32xf32> to vector<8x8xf32>
    %169 = tpu.transpose %167, [1, 0] : vector<8x8xf32> -> vector<8x8xf32>
    %cst_71 = arith.constant dense<0.000000e+00> : vector<8x8xf32>
    %170 = tpu.matmul %166, %169, %cst_71 {dimension_numbers = #tpu.dot_dimension_numbers<[1], [0], [0], [1], [0, 0, 1, 1], [], []>} : vector<8x8xf32>, vector<8x8xf32>, vector<8x8xf32> -> vector<8x8xf32>
    %171 = arith.addf %170, %3 : vector<8x8xf32>
    %cst_72 = arith.constant dense<0xFF800000> : vector<8xf32>
    %172 = vector.multi_reduction <maximumf>, %171, %cst_72 [1] : vector<8x8xf32> to vector<8xf32>
    %173 = vector.shape_cast %172 : vector<8xf32> to vector<8x1xf32>
    %174 = vector.broadcast %173 : vector<8x1xf32> to vector<8x8xf32>
    %175 = arith.subf %171, %174 : vector<8x8xf32>
    %176 = math.exp %175 : vector<8x8xf32>
    %cst_73 = arith.constant dense<0.000000e+00> : vector<8xf32>
    %177 = vector.multi_reduction <add>, %176, %cst_73 [1] : vector<8x8xf32> to vector<8xf32>
    %178 = vector.shape_cast %177 : vector<8xf32> to vector<8x1xf32>
    %179 = tpu.reciprocal %178 {approx = true} : vector<8x1xf32> -> vector<8x1xf32>
    %180 = vector.broadcast %179 : vector<8x1xf32> to vector<8x8xf32>
    %181 = arith.mulf %176, %180 : vector<8x8xf32>
    %cst_74 = arith.constant dense<0.000000e+00> : vector<8x8xf32>
    %182 = tpu.matmul %181, %168, %cst_74 {dimension_numbers = #tpu.dot_dimension_numbers<[1], [0], [0], [1], [0, 0, 1, 1], [], []>} : vector<8x8xf32>, vector<8x8xf32>, vector<8x8xf32> -> vector<8x8xf32>
    %183 = vector.extract_strided_slice %163 {offsets = [0, 8], sizes = [8, 8], strides = [1, 1]} : vector<8x32xf32> to vector<8x8xf32>
    %184 = vector.extract_strided_slice %164 {offsets = [0, 8], sizes = [8, 8], strides = [1, 1]} : vector<8x32xf32> to vector<8x8xf32>
    %185 = vector.extract_strided_slice %165 {offsets = [0, 8], sizes = [8, 8], strides = [1, 1]} : vector<8x32xf32> to vector<8x8xf32>
    %186 = tpu.transpose %184, [1, 0] : vector<8x8xf32> -> vector<8x8xf32>
    %cst_75 = arith.constant dense<0.000000e+00> : vector<8x8xf32>
    %187 = tpu.matmul %183, %186, %cst_75 {dimension_numbers = #tpu.dot_dimension_numbers<[1], [0], [0], [1], [0, 0, 1, 1], [], []>} : vector<8x8xf32>, vector<8x8xf32>, vector<8x8xf32> -> vector<8x8xf32>
    %188 = arith.addf %187, %3 : vector<8x8xf32>
    %cst_76 = arith.constant dense<0xFF800000> : vector<8xf32>
    %189 = vector.multi_reduction <maximumf>, %188, %cst_76 [1] : vector<8x8xf32> to vector<8xf32>
    %190 = vector.shape_cast %189 : vector<8xf32> to vector<8x1xf32>
    %191 = vector.broadcast %190 : vector<8x1xf32> to vector<8x8xf32>
    %192 = arith.subf %188, %191 : vector<8x8xf32>
    %193 = math.exp %192 : vector<8x8xf32>
    %cst_77 = arith.constant dense<0.000000e+00> : vector<8xf32>
    %194 = vector.multi_reduction <add>, %193, %cst_77 [1] : vector<8x8xf32> to vector<8xf32>
    %195 = vector.shape_cast %194 : vector<8xf32> to vector<8x1xf32>
    %196 = tpu.reciprocal %195 {approx = true} : vector<8x1xf32> -> vector<8x1xf32>
    %197 = vector.broadcast %196 : vector<8x1xf32> to vector<8x8xf32>
    %198 = arith.mulf %193, %197 : vector<8x8xf32>
    %cst_78 = arith.constant dense<0.000000e+00> : vector<8x8xf32>
    %199 = tpu.matmul %198, %185, %cst_78 {dimension_numbers = #tpu.dot_dimension_numbers<[1], [0], [0], [1], [0, 0, 1, 1], [], []>} : vector<8x8xf32>, vector<8x8xf32>, vector<8x8xf32> -> vector<8x8xf32>
    %200 = vector.extract_strided_slice %163 {offsets = [0, 16], sizes = [8, 8], strides = [1, 1]} : vector<8x32xf32> to vector<8x8xf32>
    %201 = vector.extract_strided_slice %164 {offsets = [0, 16], sizes = [8, 8], strides = [1, 1]} : vector<8x32xf32> to vector<8x8xf32>
    %202 = vector.extract_strided_slice %165 {offsets = [0, 16], sizes = [8, 8], strides = [1, 1]} : vector<8x32xf32> to vector<8x8xf32>
    %203 = tpu.transpose %201, [1, 0] : vector<8x8xf32> -> vector<8x8xf32>
    %cst_79 = arith.constant dense<0.000000e+00> : vector<8x8xf32>
    %204 = tpu.matmul %200, %203, %cst_79 {dimension_numbers = #tpu.dot_dimension_numbers<[1], [0], [0], [1], [0, 0, 1, 1], [], []>} : vector<8x8xf32>, vector<8x8xf32>, vector<8x8xf32> -> vector<8x8xf32>
    %205 = arith.addf %204, %3 : vector<8x8xf32>
    %cst_80 = arith.constant dense<0xFF800000> : vector<8xf32>
    %206 = vector.multi_reduction <maximumf>, %205, %cst_80 [1] : vector<8x8xf32> to vector<8xf32>
    %207 = vector.shape_cast %206 : vector<8xf32> to vector<8x1xf32>
    %208 = vector.broadcast %207 : vector<8x1xf32> to vector<8x8xf32>
    %209 = arith.subf %205, %208 : vector<8x8xf32>
    %210 = math.exp %209 : vector<8x8xf32>
    %cst_81 = arith.constant dense<0.000000e+00> : vector<8xf32>
    %211 = vector.multi_reduction <add>, %210, %cst_81 [1] : vector<8x8xf32> to vector<8xf32>
    %212 = vector.shape_cast %211 : vector<8xf32> to vector<8x1xf32>
    %213 = tpu.reciprocal %212 {approx = true} : vector<8x1xf32> -> vector<8x1xf32>
    %214 = vector.broadcast %213 : vector<8x1xf32> to vector<8x8xf32>
    %215 = arith.mulf %210, %214 : vector<8x8xf32>
    %cst_82 = arith.constant dense<0.000000e+00> : vector<8x8xf32>
    %216 = tpu.matmul %215, %202, %cst_82 {dimension_numbers = #tpu.dot_dimension_numbers<[1], [0], [0], [1], [0, 0, 1, 1], [], []>} : vector<8x8xf32>, vector<8x8xf32>, vector<8x8xf32> -> vector<8x8xf32>
    %217 = vector.extract_strided_slice %163 {offsets = [0, 24], sizes = [8, 8], strides = [1, 1]} : vector<8x32xf32> to vector<8x8xf32>
    %218 = vector.extract_strided_slice %164 {offsets = [0, 24], sizes = [8, 8], strides = [1, 1]} : vector<8x32xf32> to vector<8x8xf32>
    %219 = vector.extract_strided_slice %165 {offsets = [0, 24], sizes = [8, 8], strides = [1, 1]} : vector<8x32xf32> to vector<8x8xf32>
    %220 = tpu.transpose %218, [1, 0] : vector<8x8xf32> -> vector<8x8xf32>
    %cst_83 = arith.constant dense<0.000000e+00> : vector<8x8xf32>
    %221 = tpu.matmul %217, %220, %cst_83 {dimension_numbers = #tpu.dot_dimension_numbers<[1], [0], [0], [1], [0, 0, 1, 1], [], []>} : vector<8x8xf32>, vector<8x8xf32>, vector<8x8xf32> -> vector<8x8xf32>
    %222 = arith.addf %221, %3 : vector<8x8xf32>
    %cst_84 = arith.constant dense<0xFF800000> : vector<8xf32>
    %223 = vector.multi_reduction <maximumf>, %222, %cst_84 [1] : vector<8x8xf32> to vector<8xf32>
    %224 = vector.shape_cast %223 : vector<8xf32> to vector<8x1xf32>
    %225 = vector.broadcast %224 : vector<8x1xf32> to vector<8x8xf32>
    %226 = arith.subf %222, %225 : vector<8x8xf32>
    %227 = math.exp %226 : vector<8x8xf32>
    %cst_85 = arith.constant dense<0.000000e+00> : vector<8xf32>
    %228 = vector.multi_reduction <add>, %227, %cst_85 [1] : vector<8x8xf32> to vector<8xf32>
    %229 = vector.shape_cast %228 : vector<8xf32> to vector<8x1xf32>
    %230 = tpu.reciprocal %229 {approx = true} : vector<8x1xf32> -> vector<8x1xf32>
    %231 = vector.broadcast %230 : vector<8x1xf32> to vector<8x8xf32>
    %232 = arith.mulf %227, %231 : vector<8x8xf32>
    %cst_86 = arith.constant dense<0.000000e+00> : vector<8x8xf32>
    %233 = tpu.matmul %232, %219, %cst_86 {dimension_numbers = #tpu.dot_dimension_numbers<[1], [0], [0], [1], [0, 0, 1, 1], [], []>} : vector<8x8xf32>, vector<8x8xf32>, vector<8x8xf32> -> vector<8x8xf32>
    %234 = tpu.concatenate %182, %199, %216, %233 in 1 : vector<8x8xf32>, vector<8x8xf32>, vector<8x8xf32>, vector<8x8xf32> -> vector<8x32xf32>
    %c1_87 = arith.constant 1 : index
    %c0_88 = arith.constant 0 : index
    %c0_89 = arith.constant 0 : index
    %235 = vector.load %arg4[%c1_87, %c0_88, %c0_89] : memref<2x32x32xf32, #tpu.memory_space<vmem>>, vector<1x32x32xf32>
    %236 = vector.shape_cast %235 : vector<1x32x32xf32> to vector<32x32xf32>
    %cst_90 = arith.constant dense<0.000000e+00> : vector<8x32xf32>
    %237 = tpu.matmul %234, %236, %cst_90 {dimension_numbers = #tpu.dot_dimension_numbers<[1], [0], [0], [1], [0, 0, 1, 1], [], []>} : vector<8x32xf32>, vector<32x32xf32>, vector<8x32xf32> -> vector<8x32xf32>
    %c1_91 = arith.constant 1 : index
    %c0_92 = arith.constant 0 : index
    %c0_93 = arith.constant 0 : index
    %238 = vector.load %arg5[%c1_91, %c0_92, %c0_93] : memref<2x1x32xf32, #tpu.memory_space<vmem>>, vector<1x1x32xf32>
    %239 = vector.shape_cast %238 : vector<1x1x32xf32> to vector<1x32xf32>
    %240 = vector.broadcast %239 : vector<1x32xf32> to vector<8x32xf32>
    %241 = arith.addf %237, %240 : vector<8x32xf32>
    %242 = arith.addf %241, %159 : vector<8x32xf32>
    %cst_94 = arith.constant dense<0.000000e+00> : vector<8xf32>
    %243 = vector.multi_reduction <add>, %242, %cst_94 [1] : vector<8x32xf32> to vector<8xf32>
    %244 = vector.shape_cast %243 : vector<8xf32> to vector<8x1xf32>
    %cst_95 = arith.constant 3.200000e+01 : f32
    %245 = vector.broadcast %cst_95 : f32 to vector<8x1xf32>
    %246 = arith.divf %244, %245 : vector<8x1xf32>
    %247 = vector.broadcast %246 : vector<8x1xf32> to vector<8x32xf32>
    %248 = arith.subf %242, %247 : vector<8x32xf32>
    %249 = vector.broadcast %246 : vector<8x1xf32> to vector<8x32xf32>
    %250 = arith.subf %242, %249 : vector<8x32xf32>
    %251 = arith.mulf %248, %250 : vector<8x32xf32>
    %cst_96 = arith.constant dense<0.000000e+00> : vector<8xf32>
    %252 = vector.multi_reduction <add>, %251, %cst_96 [1] : vector<8x32xf32> to vector<8xf32>
    %253 = vector.shape_cast %252 : vector<8xf32> to vector<8x1xf32>
    %cst_97 = arith.constant 3.200000e+01 : f32
    %254 = vector.broadcast %cst_97 : f32 to vector<8x1xf32>
    %255 = arith.divf %253, %254 : vector<8x1xf32>
    %256 = vector.broadcast %246 : vector<8x1xf32> to vector<8x32xf32>
    %257 = arith.subf %242, %256 : vector<8x32xf32>
    %cst_98 = arith.constant 9.99999974E-6 : f32
    %258 = vector.broadcast %cst_98 : f32 to vector<8x1xf32>
    %259 = arith.addf %255, %258 : vector<8x1xf32>
    %260 = math.rsqrt %259 : vector<8x1xf32>
    %261 = vector.broadcast %260 : vector<8x1xf32> to vector<8x32xf32>
    %262 = arith.mulf %257, %261 : vector<8x32xf32>
    %c1_99 = arith.constant 1 : index
    %c0_100 = arith.constant 0 : index
    %c0_101 = arith.constant 0 : index
    %263 = vector.load %arg6[%c1_99, %c0_100, %c0_101] : memref<2x1x32xf32, #tpu.memory_space<vmem>>, vector<1x1x32xf32>
    %264 = vector.shape_cast %263 : vector<1x1x32xf32> to vector<1x32xf32>
    %265 = vector.broadcast %264 : vector<1x32xf32> to vector<8x32xf32>
    %266 = arith.mulf %262, %265 : vector<8x32xf32>
    %c1_102 = arith.constant 1 : index
    %c0_103 = arith.constant 0 : index
    %c0_104 = arith.constant 0 : index
    %267 = vector.load %arg7[%c1_102, %c0_103, %c0_104] : memref<2x1x32xf32, #tpu.memory_space<vmem>>, vector<1x1x32xf32>
    %268 = vector.shape_cast %267 : vector<1x1x32xf32> to vector<1x32xf32>
    %269 = vector.broadcast %268 : vector<1x32xf32> to vector<8x32xf32>
    %270 = arith.addf %266, %269 : vector<8x32xf32>
    %c1_105 = arith.constant 1 : index
    %c0_106 = arith.constant 0 : index
    %c0_107 = arith.constant 0 : index
    %271 = vector.load %arg8[%c1_105, %c0_106, %c0_107] : memref<2x32x64xf32, #tpu.memory_space<vmem>>, vector<1x32x64xf32>
    %272 = vector.shape_cast %271 : vector<1x32x64xf32> to vector<32x64xf32>
    %cst_108 = arith.constant dense<0.000000e+00> : vector<8x64xf32>
    %273 = tpu.matmul %270, %272, %cst_108 {dimension_numbers = #tpu.dot_dimension_numbers<[1], [0], [0], [1], [0, 0, 1, 1], [], []>} : vector<8x32xf32>, vector<32x64xf32>, vector<8x64xf32> -> vector<8x64xf32>
    %c1_109 = arith.constant 1 : index
    %c0_110 = arith.constant 0 : index
    %c0_111 = arith.constant 0 : index
    %274 = vector.load %arg9[%c1_109, %c0_110, %c0_111] : memref<2x1x64xf32, #tpu.memory_space<vmem>>, vector<1x1x64xf32>
    %275 = vector.shape_cast %274 : vector<1x1x64xf32> to vector<1x64xf32>
    %276 = vector.broadcast %275 : vector<1x64xf32> to vector<8x64xf32>
    %277 = arith.addf %273, %276 : vector<8x64xf32>
    %cst_112 = arith.constant 0.000000e+00 : f32
    %278 = vector.broadcast %cst_112 : f32 to vector<8x64xf32>
    %279 = arith.maximumf %277, %278 : vector<8x64xf32>
    %c1_113 = arith.constant 1 : index
    %c0_114 = arith.constant 0 : index
    %c0_115 = arith.constant 0 : index
    %280 = vector.load %arg10[%c1_113, %c0_114, %c0_115] : memref<2x64x32xf32, #tpu.memory_space<vmem>>, vector<1x64x32xf32>
    %281 = vector.shape_cast %280 : vector<1x64x32xf32> to vector<64x32xf32>
    %cst_116 = arith.constant dense<0.000000e+00> : vector<8x32xf32>
    %282 = tpu.matmul %279, %281, %cst_116 {dimension_numbers = #tpu.dot_dimension_numbers<[1], [0], [0], [1], [0, 0, 1, 1], [], []>} : vector<8x64xf32>, vector<64x32xf32>, vector<8x32xf32> -> vector<8x32xf32>
    %c1_117 = arith.constant 1 : index
    %c0_118 = arith.constant 0 : index
    %c0_119 = arith.constant 0 : index
    %283 = vector.load %arg11[%c1_117, %c0_118, %c0_119] : memref<2x1x32xf32, #tpu.memory_space<vmem>>, vector<1x1x32xf32>
    %284 = vector.shape_cast %283 : vector<1x1x32xf32> to vector<1x32xf32>
    %285 = vector.broadcast %284 : vector<1x32xf32> to vector<8x32xf32>
    %286 = arith.addf %282, %285 : vector<8x32xf32>
    %287 = arith.addf %286, %270 : vector<8x32xf32>
    %cst_120 = arith.constant dense<0.000000e+00> : vector<8xf32>
    %288 = vector.multi_reduction <add>, %287, %cst_120 [1] : vector<8x32xf32> to vector<8xf32>
    %289 = vector.shape_cast %288 : vector<8xf32> to vector<8x1xf32>
    %cst_121 = arith.constant 3.200000e+01 : f32
    %290 = vector.broadcast %cst_121 : f32 to vector<8x1xf32>
    %291 = arith.divf %289, %290 : vector<8x1xf32>
    %292 = vector.broadcast %291 : vector<8x1xf32> to vector<8x32xf32>
    %293 = arith.subf %287, %292 : vector<8x32xf32>
    %294 = vector.broadcast %291 : vector<8x1xf32> to vector<8x32xf32>
    %295 = arith.subf %287, %294 : vector<8x32xf32>
    %296 = arith.mulf %293, %295 : vector<8x32xf32>
    %cst_122 = arith.constant dense<0.000000e+00> : vector<8xf32>
    %297 = vector.multi_reduction <add>, %296, %cst_122 [1] : vector<8x32xf32> to vector<8xf32>
    %298 = vector.shape_cast %297 : vector<8xf32> to vector<8x1xf32>
    %cst_123 = arith.constant 3.200000e+01 : f32
    %299 = vector.broadcast %cst_123 : f32 to vector<8x1xf32>
    %300 = arith.divf %298, %299 : vector<8x1xf32>
    %301 = vector.broadcast %291 : vector<8x1xf32> to vector<8x32xf32>
    %302 = arith.subf %287, %301 : vector<8x32xf32>
    %cst_124 = arith.constant 9.99999974E-6 : f32
    %303 = vector.broadcast %cst_124 : f32 to vector<8x1xf32>
    %304 = arith.addf %300, %303 : vector<8x1xf32>
    %305 = math.rsqrt %304 : vector<8x1xf32>
    %306 = vector.broadcast %305 : vector<8x1xf32> to vector<8x32xf32>
    %307 = arith.mulf %302, %306 : vector<8x32xf32>
    %c1_125 = arith.constant 1 : index
    %c0_126 = arith.constant 0 : index
    %c0_127 = arith.constant 0 : index
    %308 = vector.load %arg12[%c1_125, %c0_126, %c0_127] : memref<2x1x32xf32, #tpu.memory_space<vmem>>, vector<1x1x32xf32>
    %309 = vector.shape_cast %308 : vector<1x1x32xf32> to vector<1x32xf32>
    %310 = vector.broadcast %309 : vector<1x32xf32> to vector<8x32xf32>
    %311 = arith.mulf %307, %310 : vector<8x32xf32>
    %c1_128 = arith.constant 1 : index
    %c0_129 = arith.constant 0 : index
    %c0_130 = arith.constant 0 : index
    %312 = vector.load %arg13[%c1_128, %c0_129, %c0_130] : memref<2x1x32xf32, #tpu.memory_space<vmem>>, vector<1x1x32xf32>
    %313 = vector.shape_cast %312 : vector<1x1x32xf32> to vector<1x32xf32>
    %314 = vector.broadcast %313 : vector<1x32xf32> to vector<8x32xf32>
    %315 = arith.addf %311, %314 : vector<8x32xf32>
    %c0_131 = arith.constant 0 : index
    %c0_132 = arith.constant 0 : index
    %c0_133 = arith.constant 0 : index
    %316 = vector.load %arg14[%c0_131, %c0_132, %c0_133] : memref<1x8x32xf32, #tpu.memory_space<vmem>>, vector<1x8x32xf32>
    %317 = vector.shape_cast %316 : vector<1x8x32xf32> to vector<8x32xf32>
    %318 = vector.shape_cast %315 : vector<8x32xf32> to vector<1x8x32xf32>
    tpu.vector_store %arg14[%c0_131, %c0_132, %c0_133], %318 {strides = array<i32>} : memref<1x8x32xf32, #tpu.memory_space<vmem>>, vector<1x8x32xf32>,
    return
  }
  func.func @transform_0(%arg0: i32) -> (i32, i32, i32) {
    %c0_i32 = arith.constant 0 : i32
    %c0_i32_0 = arith.constant 0 : i32
    %c0_i32_1 = arith.constant 0 : i32
    return %arg0, %c0_i32, %c0_i32_0 : i32, i32, i32
  }
  func.func @transform_1(%arg0: i32) -> (i32, i32, i32) {
    %c0_i32 = arith.constant 0 : i32
    %c0_i32_0 = arith.constant 0 : i32
    %c0_i32_1 = arith.constant 0 : i32
    return %arg0, %c0_i32, %c0_i32_0 : i32, i32, i32
  }
  func.func @transform_2(%arg0: i32) -> (i32, i32, i32) {
    %c0_i32 = arith.constant 0 : i32
    %c0_i32_0 = arith.constant 0 : i32
    %c0_i32_1 = arith.constant 0 : i32
    %c0_i32_2 = arith.constant 0 : i32
    return %c0_i32, %c0_i32_0, %c0_i32_1 : i32, i32, i32
  }
  func.func @transform_3(%arg0: i32) -> (i32, i32, i32) {
    %c0_i32 = arith.constant 0 : i32
    %c0_i32_0 = arith.constant 0 : i32
    %c0_i32_1 = arith.constant 0 : i32
    %c0_i32_2 = arith.constant 0 : i32
    return %c0_i32, %c0_i32_0, %c0_i32_1 : i32, i32, i32
  }
  func.func @transform_4(%arg0: i32) -> (i32, i32, i32) {
    %c0_i32 = arith.constant 0 : i32
    %c0_i32_0 = arith.constant 0 : i32
    %c0_i32_1 = arith.constant 0 : i32
    %c0_i32_2 = arith.constant 0 : i32
    return %c0_i32, %c0_i32_0, %c0_i32_1 : i32, i32, i32
  }
  func.func @transform_5(%arg0: i32) -> (i32, i32, i32) {
    %c0_i32 = arith.constant 0 : i32
    %c0_i32_0 = arith.constant 0 : i32
    %c0_i32_1 = arith.constant 0 : i32
    %c0_i32_2 = arith.constant 0 : i32
    return %c0_i32, %c0_i32_0, %c0_i32_1 : i32, i32, i32
  }
  func.func @transform_6(%arg0: i32) -> (i32, i32, i32) {
    %c0_i32 = arith.constant 0 : i32
    %c0_i32_0 = arith.constant 0 : i32
    %c0_i32_1 = arith.constant 0 : i32
    %c0_i32_2 = arith.constant 0 : i32
    return %c0_i32, %c0_i32_0, %c0_i32_1 : i32, i32, i32
  }
  func.func @transform_7(%arg0: i32) -> (i32, i32, i32) {
    %c0_i32 = arith.constant 0 : i32
    %c0_i32_0 = arith.constant 0 : i32
    %c0_i32_1 = arith.constant 0 : i32
    %c0_i32_2 = arith.constant 0 : i32
    return %c0_i32, %c0_i32_0, %c0_i32_1 : i32, i32, i32
  }
  func.func @transform_8(%arg0: i32) -> (i32, i32, i32) {
    %c0_i32 = arith.constant 0 : i32
    %c0_i32_0 = arith.constant 0 : i32
    %c0_i32_1 = arith.constant 0 : i32
    %c0_i32_2 = arith.constant 0 : i32
    return %c0_i32, %c0_i32_0, %c0_i32_1 : i32, i32, i32
  }
  func.func @transform_9(%arg0: i32) -> (i32, i32, i32) {
    %c0_i32 = arith.constant 0 : i32
    %c0_i32_0 = arith.constant 0 : i32
    %c0_i32_1 = arith.constant 0 : i32
    %c0_i32_2 = arith.constant 0 : i32
    return %c0_i32, %c0_i32_0, %c0_i32_1 : i32, i32, i32
  }
  func.func @transform_10(%arg0: i32) -> (i32, i32, i32) {
    %c0_i32 = arith.constant 0 : i32
    %c0_i32_0 = arith.constant 0 : i32
    %c0_i32_1 = arith.constant 0 : i32
    %c0_i32_2 = arith.constant 0 : i32
    return %c0_i32, %c0_i32_0, %c0_i32_1 : i32, i32, i32
  }
  func.func @transform_11(%arg0: i32) -> (i32, i32, i32) {
    %c0_i32 = arith.constant 0 : i32
    %c0_i32_0 = arith.constant 0 : i32
    %c0_i32_1 = arith.constant 0 : i32
    %c0_i32_2 = arith.constant 0 : i32
    return %c0_i32, %c0_i32_0, %c0_i32_1 : i32, i32, i32
  }
  func.func @transform_12(%arg0: i32) -> (i32, i32, i32) {
    %c0_i32 = arith.constant 0 : i32
    %c0_i32_0 = arith.constant 0 : i32
    %c0_i32_1 = arith.constant 0 : i32
    %c0_i32_2 = arith.constant 0 : i32
    return %c0_i32, %c0_i32_0, %c0_i32_1 : i32, i32, i32
  }
  func.func @transform_13(%arg0: i32) -> (i32, i32, i32) {
    %c0_i32 = arith.constant 0 : i32
    %c0_i32_0 = arith.constant 0 : i32
    %c0_i32_1 = arith.constant 0 : i32
    return %arg0, %c0_i32, %c0_i32_0 : i32, i32, i32
  }
}

</mosaic_0001>

<bundles_post_ra>
// kernel: tpu_custom_call.1
= control target key start
LH: loop header
LB: loop body
LE: loop exit
PB: predicated region body
PF: predicated region fallthrough
CT: control target
= control target key end

     0   :  { %s2610_s0 = inlined_call_operand.hbm [shape: f32[2,8,32], index: 0, kind: input, shape index: {}]   ;;  %s2611_s1 = inlined_call_operand.hbm [shape: f32[2,8,8], index: 1, kind: input, shape index: {}]   ;;  %s2612_s2 = inlined_call_operand.vmem [shape: f32[2,32,96], index: 2, kind: input, shape index: {}]   ;;  %s2613_s3 = inlined_call_operand.vmem [shape: f32[2,32,32], index: 3, kind: input, shape index: {}]   ;;  %s2614_s4 = inlined_call_operand.vmem [shape: f32[2,1,32], index: 4, kind: input, shape index: {}]   ;;  %s2615_s5 = inlined_call_operand.hbm [shape: f32[2,1,32], index: 5, kind: input, shape index: {}]   ;;  %s2616_s6 = inlined_call_operand.vmem [shape: f32[2,1,32], index: 6, kind: input, shape index: {}]   ;;  %s2617_s7 = inlined_call_operand.vmem [shape: f32[2,32,64], index: 7, kind: input, shape index: {}]   ;;  %s2618_s8 = inlined_call_operand.hbm [shape: f32[2,1,64], index: 8, kind: input, shape index: {}]   ;;  %s2619_s9 = inlined_call_operand.vmem [shape: f32[2,64,32], index: 9, kind: input, shape index: {}]   ;;  %s2620_s10 = inlined_call_operand.vmem [shape: f32[2,1,32], index: 10, kind: input, shape index: {}]   ;;  %s2621_s11 = inlined_call_operand.vmem [shape: f32[2,1,32], index: 11, kind: input, shape index: {}]   ;;  %s2622_s12 = inlined_call_operand.vmem [shape: f32[2,1,32], index: 12, kind: input, shape index: {}]   ;;  %s2623_s13 = inlined_call_operand.hbm [shape: f32[2,8,32], index: 13, kind: output, shape index: {}]  }
   0x1   :  { %2641 = sst [smem:[#allocation23_spill]] %s2615_s5 }
   0x2   :  { %2642 = sst [smem:[#allocation24_spill]] %s2618_s8 }
   0x3   :  { %2643 = sst [smem:[#allocation25_spill]] %s2621_s11 }
   0x4   :  { %2644 = sst [smem:[#allocation26_spill]] %s2622_s12 }
   0x5   :  { %2645 = sst [smem:[#allocation27_spill]] %s2623_s13 }
   0x6   :  { %18 = vsyncpa [#allocation3], 0 }
   0x7   :  { %20 = vsyncpa [#allocation3 + $0x1], 0 }
   0x8   :  { %21 = vsyncpa [#allocation6], 0 }
   0x9   :  { %23 = vsyncpa [#allocation6 + $0x1], 0 }
   0xa   :  { %24 = vsyncpa [#allocation9], 0 }
   0xb   :  { %25 = vsyncpa [#allocation4], 0 }
   0xc   :  { %27 = vsyncpa [#allocation4 + $0x1], 0  ;;  %s2124_s25 = smov 0   ;;  %s2126_s26 = smov 0  }
   0xd   :  { %s2128_s27 = smov 0   ;;  %s2130_s28 = smov 0  }
   0xe LB: > { %2646 = sst [smem:[#allocation16_spill]] %s2021_s25  ;;  %s2148_s15 = sadd.s32 4294967295, %s2033_s28   ;;  %s2033_s28 = sphi %s2130_s28, %s2676_s28   ;;  %s2029_s27 = sphi %s2128_s27, %s2678_s27   ;;  %s2025_s26 = sphi %s2126_s26, %s2680_s26   ;;  %s2021_s25 = sphi %s2124_s25, %s2679_s25  }
   0xf   : > { %2647 = sst [smem:[#allocation17_spill]] %s2029_s27  ;;  %p1615_p0 = scmp.ge.s32.totalorder %s2033_s28, 1 }
  0x10   : > { %2648 = sst [smem:[#allocation18_spill]] %s2033_s28  ;;  %p54_p1 = scmp.eq.s32.totalorder %s2148_s15, 0 }
  0x11   : > { %s2649_s5 = sld [smem:[#allocation23_spill]]  ;;  %p347_p2 = scmp.lt.s32.totalorder %s2033_s28, 3 }
  0x12   : > { %s2035_s17 = smov [#allocation7]   ;;  %s2651_s8 = sld [smem:[#allocation24_spill]] }
  0x13   : > { %p2153_p3 = pnand %p1615_p0, %p347_p2  ;;  %s369_s18 = sshll.u32 %s2035_s17, 4  ;;  %s370_s18 = int_to_ptr.vmem [resolvable:$true] %s369_s18 }
  0x14   : > { %s2036_s22 = smov [#allocation8]   ;;  %s2037_s24 = smov 16  }
  0x15   : > { %p1704_p4 = pneg %p2153_p3  ;;  %s389_s23 = sshll.u32 %s2036_s22, 4  ;;  %s390_s23 = int_to_ptr.vmem [resolvable:$true] %s389_s23 }
  0x16   : > { %s2038_s29 = smov 1   ;;  %s1614_s30 = sadd.s32 4294967294, %s2033_s28  }
  0x17   : > { %s367_s14 = sshll.u32 %s2649_s5, 4  ;;  %p1705_p6 = pnand %p1704_p4, %p54_p1  ;;  %s368_s14 = int_to_ptr.hbm [resolvable:$true] %s367_s14 }
  0x18   : > { %s387_s21 = sshll.u32 %s2651_s8, 4  ;;  %s2167_s17 = sadd.s32 1, %s2033_s28   ;;  %s388_s21 = int_to_ptr.hbm [resolvable:$true] %s387_s21 }
  0x19   : > { %1707 = dma.hbm_to_vmem [thread:$0]  (!%p1705_p6), %s368_s14, 32, %s370_s18, [#allocation6], %s2037_s24, %s2037_s24, %s2038_s29  }
  0x1a   : > { %1710 = dma.hbm_to_vmem [thread:$0]  (!%p1705_p6), %s388_s21, 32, %s390_s23, [#allocation9], %s2037_s24, %s2037_s24, %s2038_s29  }
  0x1b   : > { %2652 = sst [smem:[#allocation19_spill]] %s2167_s17  ;;  %s37_s19 = ssub.s32 %s2033_s28, %s2167_s17 }
  0x1c   : > { %s40_s20 = sadd.s32 1, %s2029_s27  ;;  %p38_p7 = scmp.eq.s32.totalorder %s37_s19, 0 }
  0x1d   : > { %p47_p8 = scmp.ne.s32.totalorder %s2029_s27, %s2025_s26  ;;  %p48_p9 = scmp.eq.s32.totalorder %s2033_s28, 0 }
  0x1e   : > { %p53_p10 = scmp.ne.s32.totalorder %s2025_s26, %s2021_s25  ;;  %p334_p13 = scmp.eq.s32.totalorder %s2148_s15, 1 }
  0x1f   : > { %s2178_s22 = scalar_select %p38_p7, %s2029_s27, %s40_s20  }
  0x20   : > { %p2180_p11 = por %p48_p9, %p47_p8  ;;  %p2186_p12 = por %p54_p1, %p53_p10 }
  0x21   : > { %2653 = sst [smem:[#allocation20_spill]] %s2178_s22  ;;  %p340_p0 = scmp.eq.s32.totalorder %s1614_s30, 1 }
  0x22   : > { %p1724_p2 = scmp.lt.s32.totalorder %s2033_s28, 2  ;;  %s415_s18 = sand.u32 1, %s2029_s27  }
  0x23   : > { %p2193_p4 = por %p334_p13, %p47_p8  ;;  %p2197_p6 = por %p340_p0, %p53_p10 }
  0x24   : > { %s2201_s24 = sshll.u32 %s415_s18, 3  ;;  %s1620_s29 = sshll.u32 %s2033_s28, 3 }
  0x25   : > { %s2656_s21 = scalar_select %p2193_p4, 1, 0 }
  0x26   : > { %s2658_s23 = scalar_select %p2197_p6, 1, 0 }
  0x27   : > { %2657 = sst [smem:[#allocation21_spill]] %s2656_s21  ;;  %s423_s8 = scalar_lea.hbm %s2610_s0, %s1620_s29 }
  0x28   : > { %2659 = sst [smem:[#allocation22_spill]] %s2658_s23  ;;  %s419_s22 = scalar_lea.vmem [#allocation2], %s2201_s24 }
  0x29   : > { %s427_s30 = sshll.u32 %s419_s22, 4  ;;  %s425_s17 = sshll.u32 %s423_s8, 4  ;;  %s428_s30 = int_to_ptr.vmem [resolvable:$true] %s427_s30  ;;  %s426_s17 = int_to_ptr.hbm [resolvable:$true] %s425_s17 }
  0x2a   : > { %p2210_p7 = pnand %p1724_p2, %p2180_p11  ;;  %s442_s21 = scalar_lea.hbm %s2611_s1, %s1620_s29 }
  0x2b   : > { %s434_s13 = sand.u32 1, %s2033_s28   ;;  %s416_s12 = scalar_lea.sflag [#allocation3], %s415_s18 }
  0x2c   : > { %s1895_s19 = sshra.s32 %s426_s17, 4  ;;  %p1899_p9 = pneg %p2210_p7  ;;  %s1896_s19 = int_to_ptr.hbm [resolvable:$true] %s1895_s19 }
  0x2d   : > { %s1897_s20 = scalar_lea.hbm %s1896_s19, 8  ;;  %s1902_s22 = scalar_lea.hbm %s2610_s0, 16 }
  0x2e   : > { %p1898_p8 = scmp.ne.s32.totalorder %s1896_s19, %s1897_s20  ;;  %p1903_p13 = scmp.lt.s32.totalorder %s1896_s19, %s2610_s0 }
  0x2f   : > { %p1904_p0 = scmp.lt.s32.totalorder %s1902_s22, %s1897_s20 }
  0x30   : > { %p1900_p10 = pnand %p1899_p9, %p1898_p8 }
  0x31   : > { %p1905_p2 = por %p1904_p0, %p1903_p13 }
  0x32   : > { %p1901_p11 = pneg %p1900_p10 }
  0x34   : > { %p1906_p5 = pnand %p1905_p2, %p1901_p11 }
  0x36   : > { %1909 = shalt.err (!%p1906_p5)
}
  0x37   : > { %1714 = dma.hbm_to_vmem [thread:$0]  (!%p2210_p7), %s426_s17, 128, %s428_s30, %s416_s12  }
  0x38   : > { %s444_s18 = sshll.u32 %s442_s21, 4  ;;  %s438_s29 = scalar_lea.vmem [#allocation5], %s2201_s24  ;;  %s445_s18 = int_to_ptr.hbm [resolvable:$true] %s444_s18 }
  0x39   : > { %s446_s28 = sshll.u32 %s438_s29, 4  ;;  %s435_s5 = scalar_lea.sflag [#allocation6], %s434_s13  ;;  %s447_s28 = int_to_ptr.vmem [resolvable:$true] %s446_s28 }
  0x3a   : > { %s1925_s8 = sshra.s32 %s445_s18, 4  ;;  %s1932_s22 = scalar_lea.hbm %s2611_s1, 16  ;;  %s1926_s8 = int_to_ptr.hbm [resolvable:$true] %s1925_s8 }
  0x3b   : > { %s1927_s11 = scalar_lea.hbm %s1926_s8, 8  ;;  %p1933_p5 = scmp.lt.s32.totalorder %s1926_s8, %s2611_s1 }
  0x3c   : > { %p1928_p8 = scmp.ne.s32.totalorder %s1926_s8, %s1927_s11  ;;  %p1934_p13 = scmp.lt.s32.totalorder %s1932_s22, %s1927_s11 }
  0x3e   : > { %p1930_p10 = pnand %p1928_p8, %p1899_p9  ;;  %p1935_p0 = por %p1934_p13, %p1933_p5 }
  0x40   : > { %p1931_p11 = pneg %p1930_p10 }
  0x42   : > { %p1936_p2 = pnand %p1935_p0, %p1931_p11 }
  0x44   : > { %1939 = shalt.err (!%p1936_p2)
}
  0x45   : > { %1717 = dma.hbm_to_vmem [thread:$0]  (!%p2210_p7), %s445_s18, 128, %s447_s28, %s435_s5  }
  0x46   : > { %455 = sbr.rel (%p2153_p3) target bundleno = 4515 (0x11a3), region = 72  ;;  %s2246_s13 = sand.u32 (!%p2153_p3), 1, %s2025_s26  }
  0x47   : > { %s2249_s17 = sshll.u32 (!%p2153_p3), %s2246_s13, 3  ;;  %s458_s21 = scalar_lea.sflag (!%p2153_p3), [#allocation3], %s2246_s13 }
  0x48   : > { %s461_s11 = scalar_lea.vmem (!%p2153_p3), [#allocation2], %s2249_s17 }
  0x4b   : > { %2000 = dma.done.wait (%p2186_p12), %s458_s21, 128  }
  0x4c   : > { %2002 = vsyncadd (%p2186_p12), %s458_s21, 4294967168  ;;  %s467_s27 = sand.u32 1, %s2148_s15   ;;  %s471_s16 = scalar_lea.vmem [#allocation5], %s2249_s17 }
  0x4d   : > { %s468_s28 = scalar_lea.sflag [#allocation6], %s467_s27 }
  0x4e   : > { %2004 = dma.done.wait (%p2186_p12), %s468_s28, 128  }
  0x4f   : > { %2006 = vsyncadd (%p2186_p12), %s468_s28, 4294967168 }
  0x50   : > { %2008 = dma.done.wait (%p54_p1), [#allocation6], 32  }
  0x51   : > { %2010 = vsyncadd (%p54_p1), [#allocation6], 4294967264 }
  0x52   : > { %2012 = dma.done.wait (%p54_p1), [#allocation9], 32  }
  0x53   : > { %2014 = vsyncadd (%p54_p1), [#allocation9], 4294967264  ;;  %v535_v0 = vld [vmem:[%s2612_s2 + $0x18] sm:$0xff]  ;;  %v534_v1 = vld [vmem:[%s2612_s2 + $0x10] sm:$0xff]  ;;  %vm536_vm0 = vcmask 261120   ;;  %s2039_s19 = smov 88  }
  0x54   : > { %552 = vmatpush.msra.mxu0 %v535_v0  ;;  %v533_v2 = vld [vmem:[%s2612_s2 + $0x8] sm:$0xff]  ;;  %v532_v3 = vld [vmem:[%s2612_s2] sm:$0xff]  ;;  %s2040_s20 = smov 64   ;;  %s2041_s22 = smov 96   ;;  %vm563_vm1 = vcmask 64512   ;;  %v2312_v13 = vld [vmem:[%s471_s16] sm:$0xff] }
  0x55   : > { %v2283_v4 = vld [vmem:[%s461_s11] sm:$0xff]  ;;  %s2042_s25 = smov 120   ;;  %s2043_s12 = smov 80   ;;  %vm833_vm2 = vcmask 130048   ;;  %vm835_vm3 = vcmask 195584   ;;  %vm952_vm8 = vcmask 523264  }
  0x56   : > { %553 = vmatpush.msra.mxu0 %v534_v1  ;;  %s2044_s21 = smov 72   ;;  %s2045_s11 = smov 112  }
  0x57   : > { %s2046_s27 = smov 104   ;;  %s2635_s28 = smov 40  }
  0x58   : > { %554 = vmatpush.msra.mxu0 %v533_v2  ;;  %s2640_s16 = smov 56   ;;  %s2636_s24 = smov 48   ;;  %v840_v2 = vld [vmem:[%s2613_s3 + $0x18] sm:$0xff] }
  0x59   : > { %s2638_s30 = smov 8   ;;  %s2637_s23 = smov 24  }
  0x5a   : > { %555 = vmatpush.msra.mxu0 %v532_v3  ;;  %s2639_s18 = smov 16   ;;  %v839_v3 = vld [vmem:[%s2613_s3 + $0x10] sm:$0xff]  ;;  %s2663_s14 = sld [smem:[#allocation26_spill]] }
  0x5b   : > { %1629 = vmatmul.msk.f32.vlgmr.msra.gmra.mxu0 %vm536_vm0, %v2283_v4  ;;  %s1487_s29 = scalar_lea.sflag [#allocation4], %s2246_s13 }
  0xd8   : > { %v2287_v5 = vpop.f32.mrf.mxu0 }
  0xd9   : > { %627 = vrot.lane.b32.xlu2 %v2287_v5, %s2039_s19  ;;  %599 = vrot.lane.b32.xlu1 %v2287_v5, %s2040_s20 }
  0xda   : > { %561 = vrot.lane.b32.xlu0 %v2287_v5, %s2041_s22 }
  0xe1   : > { %625 = vrot.lane.b32.xlu2 %v2287_v5, %s2042_s25 }
  0xe9   : > { %692 = vrot.lane.b32.xlu2 %v2287_v5, %s2043_s12 }
  0xf1   : > { %757 = vrot.lane.b32.xlu2 %v2287_v5, %s2044_s21 }
  0xf9   : > { %690 = vrot.lane.b32.xlu2 %v2287_v5, %s2045_s11 }
 0x133   : > { %v628_v6 = vpop.permute.xlu2 %627 }
 0x13b   : > { %v626_v7 = vpop.permute.xlu2 %625 }
 0x143   : > { %v693_v8 = vpop.permute.xlu2 %692 }
 0x14b   : > { %v758_v9 = vpop.permute.xlu2 %757  ;;  %v600_v10 = vpop.permute.xlu1 %599 }
 0x14c   : > { %v562_v11 = vpop.permute.xlu0 %561  ;;  %620 = vmatpush.msra.mxu3 %v600_v10  ;;  %1639 = vmatpush.xpose.msk.msrb.mxu0 %vm563_vm1, %v758_v9 }
 0x14d   : > { %1630 = vmatpush.xpose.msk.msra.mxu1 %vm563_vm1, %v562_v11 }
 0x14e   : > { %1633 = vmatpush.xpose.msk.msrb.mxu3 %vm563_vm1, %v628_v6  ;;  %v837_v6 = vld [vmem:[%s2613_s3] sm:$0xff] }
 0x150   : > { %1631 = vmatmul.msk.f32.vlgmr.msra.gmra.mxu1 %vm563_vm1, %v2287_v5 }
 0x151   : > { %1636 = vmatpush.xpose.msk.msrb.mxu1 %vm563_vm1, %v693_v8 }
 0x153   : > { %v691_v12 = vpop.permute.xlu2 %690 }
 0x155   : > { %860 = vmatpush.msra.mxu1 %v840_v2 }
 0x157   : > { %861 = vmatpush.msra.mxu1 %v839_v3 }
 0x158   : > { %1637 = vmatmul.msk.f32.vlgmr.msrb.gmra.mxu1 %vm563_vm1, %v691_v12 }
 0x1cd   : > { %v585_v14 = vpop.f32.mrf.mxu1 }
 0x1ce   : > { %v586_v15 = vadd.f32 %v585_v14, %v2312_v13  ;;  %v1779_v14 = vld [vmem:[%s2614_s4] ss:$0 sm:$0xff] }
 0x1d0   : > { %v588_v16 = vsel %vm563_vm1, %v586_v15, -inf }
 0x1d1   : > { %589 = vmax.xlane.f32.xlu0 %v588_v16 }
 0x1d5   : > { %v715_v22 = vpop.f32.mrf.mxu1 }
 0x1d6   : > { %v716_v23 = vadd.f32 %v715_v22, %v2312_v13 }
 0x1d8   : > { %v718_v24 = vsel %vm563_vm1, %v716_v23, -inf }
 0x244   : > { %v590_v17 = vpop.xlane.xlu0 %589 }
 0x245   : > { %v591_v18 = vsub.f32 %v586_v15, %v590_v17 }
 0x247   : > { %v592_v19 = vmul.f32 1.442695, %v591_v18 }
 0x249   : > { %1793 = vpow2.f32 %v592_v19  ;;  %v2053_v19 = vmov 32.0  }
 0x24f   : > { %v1794_v20 = vpop.eup %1793 }
 0x250   : > { %v594_v21 = vsel %vm563_vm1, %v1794_v20, 0.0 }
 0x251   : > { %595 = vadd.xlane.f32.xlu1 %v594_v21 }
 0x26a   : > { %755 = vrot.lane.b32.xlu1 %v2287_v5, %s2046_s27 }
 0x294   : > { %719 = vmax.xlane.f32.xlu1 %v718_v24 }
 0x2ad   : > { %794 = vrot.lane.b32.xlu1 %v2287_v5, %s2635_s28  ;;  %s2661_s28 = sld [smem:[#allocation25_spill]] }
 0x2c4   : > { %v596_v25 = vpop.xlane.xlu1 %595 }
 0x2c5   : > { %1795 = vrcp.f32 %v596_v25 }
 0x2cb   : > { %v1796_v26 = vpop.eup %1795 }
 0x2cc   : > { %v598_v27 = vmul.f32 %v1796_v26, %v1794_v20 }
 0x2ce   : > { %1632 = vmatmul.msk.f32.vlgmr.msra.gmra.mxu3 %vm563_vm1, %v598_v27 }
 0x2d6   : > { %1634 = vmatmul.msk.f32.vlgmr.msrb.gmra.mxu3 %vm563_vm1, %v626_v7 }
 0x2dc   : > { %v756_v28 = vpop.permute.xlu1 %755 }
 0x2dd   : > { %1640 = vmatmul.msk.f32.vlgmr.msrb.gmra.mxu0 %vm563_vm1, %v756_v28 }
 0x307   : > { %v720_v29 = vpop.xlane.xlu1 %719 }
 0x308   : > { %v721_v31 = vsub.f32 %v716_v23, %v720_v29 }
 0x30a   : > { %v722_v32 = vmul.f32 1.442695, %v721_v31  ;;  %v910_v31 = vld [vmem:[%s2617_s7 + $0x10] sm:$0xff] }
 0x30c   : > { %1797 = vpow2.f32 %v722_v32  ;;  %v909_v32 = vld [vmem:[%s2617_s7 + $0x8] sm:$0xff] }
 0x312   : > { %v1798_v39 = vpop.eup %1797 }
 0x313   : > { %v724_v40 = vsel %vm563_vm1, %v1798_v39, 0.0 }
 0x31f   : > { %v795_v48 = vpop.permute.xlu1 %794 }
 0x351   : > { %v2326_v30 = vpop.f32.mrf.mxu3 }
 0x359   : > { %v650_v33 = vpop.f32.mrf.mxu3 }
 0x35a   : > { %v651_v34 = vadd.f32 %v650_v33, %v2312_v13  ;;  %v780_v35 = vpop.f32.mrf.mxu0  ;;  %v908_v33 = vld [vmem:[%s2617_s7] sm:$0xff] }
 0x35b   : > { %v781_v36 = vadd.f32 %v780_v35, %v2312_v13  ;;  %v946_v35 = vld [vmem:[%s2619_s9 + $0x30] sm:$0xff] }
 0x35c   : > { %v653_v37 = vsel %vm563_vm1, %v651_v34, -inf }
 0x35d   : > { %654 = vmax.xlane.f32.xlu2 %v653_v37  ;;  %v783_v38 = vsel %vm563_vm1, %v781_v36, -inf }
 0x35e   : > { %784 = vmax.xlane.f32.xlu0 %v783_v38 }
 0x366   : > { %725 = vadd.xlane.f32.xlu0 %v724_v40 }
 0x375   : > { %664 = vrot.lane.b32.xlu2 %v2287_v5, %s2640_s16 }
 0x3d0   : > { %v655_v41 = vpop.xlane.xlu2 %654 }
 0x3d1   : > { %v785_v42 = vpop.xlane.xlu0 %784  ;;  %v656_v44 = vsub.f32 %v651_v34, %v655_v41  ;;  %v947_v34 = vld [vmem:[%s2619_s9 + $0x38] sm:$0xff] }
 0x3d2   : > { %v786_v43 = vsub.f32 %v781_v36, %v785_v42  ;;  %964 = vmatpush.msra.mxu0 %v947_v34  ;;  %v945_v36 = vld [vmem:[%s2619_s9 + $0x28] sm:$0xff]  ;;  %v943_v41 = vld [vmem:[%s2619_s9 + $0x18] sm:$0xff] }
 0x3d3   : > { %v657_v46 = vmul.f32 1.442695, %v656_v44 }
 0x3d4   : > { %v787_v45 = vmul.f32 1.442695, %v786_v43  ;;  %965 = vmatpush.msra.mxu0 %v946_v35 }
 0x3d6   : > { %1799 = vpow2.f32 %v787_v45  ;;  %966 = vmatpush.msra.mxu0 %v945_v36 }
 0x3d7   : > { %1801 = vpow2.f32 %v657_v46 }
 0x3d8   : > { %v665_v47 = vpop.permute.xlu2 %664 }
 0x3d9   : > { %685 = vmatpush.msra.mxu2 %v665_v47  ;;  %v726_v53 = vpop.xlane.xlu0 %725 }
 0x3db   : > { %815 = vmatpush.msrb.mxu2 %v795_v48  ;;  %v1780_v48 = vld [vmem:[#allocation7] ss:$0 sm:$0xff] }
 0x3dc   : > { %v1800_v49 = vpop.eup %1799 }
 0x3dd   : > { %v789_v50 = vsel %vm563_vm1, %v1800_v49, 0.0  ;;  %v1802_v51 = vpop.eup %1801 }
 0x3de   : > { %790 = vadd.xlane.f32.xlu0 %v789_v50  ;;  %v659_v52 = vsel %vm563_vm1, %v1802_v51, 0.0 }
 0x3e6   : > { %660 = vadd.xlane.f32.xlu0 %v659_v52 }
 0x3fa   : > { %729 = vrot.lane.b32.xlu0 %v2287_v5, %s2636_s24  ;;  %v838_v5 = vld [vmem:[%s2613_s3 + $0x8] sm:$0xff]  ;;  %s2662_s24 = smov %s2661_s28 }
 0x3fb   : > { %862 = vmatpush.msra.mxu1 %v838_v5 }
 0x3fd   : > { %863 = vmatpush.msra.mxu1 %v837_v6 }
 0x451   : > { %v791_v54 = vpop.xlane.xlu0 %790 }
 0x459   : > { %v661_v55 = vpop.xlane.xlu0 %660 }
 0x45a   : > { %1803 = vrcp.f32 %v661_v55  ;;  %v941_v55 = vld [vmem:[%s2619_s9 + $0x8] sm:$0xff] }
 0x45b   : > { %1805 = vrcp.f32 %v791_v54  ;;  %v942_v54 = vld [vmem:[%s2619_s9 + $0x10] sm:$0xff] }
 0x45c   : > { %1807 = vrcp.f32 %v726_v53 }
 0x45d   : > { %1809 = vrcp.f32 %v2053_v19 }
 0x460   : > { %v1804_v56 = vpop.eup %1803 }
 0x461   : > { %v663_v57 = vmul.f32 %v1804_v56, %v1802_v51  ;;  %v1806_v58 = vpop.eup %1805  ;;  %v1781_v51 = vld [vmem:[%s2616_s6] ss:$0 sm:$0xff] }
 0x462   : > { %v1808_v59 = vpop.eup %1807  ;;  %v793_v60 = vmul.f32 %v1806_v58, %v1800_v49  ;;  %v940_v56 = vld [vmem:[%s2619_s9] sm:$0xff] }
 0x463   : > { %1635 = vmatmul.msk.f32.vlgmr.msra.gmra.mxu2 %vm563_vm1, %v663_v57  ;;  %v728_v61 = vmul.f32 %v1808_v59, %v1798_v39  ;;  %v1810_v20 = vpop.eup %1809  ;;  %v944_v39 = vld [vmem:[%s2619_s9 + $0x20] sm:$0xff] }
 0x464   : > { %v873_v21 = vmul.f32 32.0, %v1810_v20  ;;  %vm877_vm4 = vweird.f32 %v1810_v20  ;;  %967 = vmatpush.msra.mxu0 %v944_v39  ;;  %v1782_v57 = vld [vmem:[#allocation8] ss:$0 sm:$0xff] }
 0x466   : > { %v874_v22 = vsub.f32 1.0, %v873_v21  ;;  %968 = vmatpush.msra.mxu0 %v943_v41 }
 0x468   : > { %v875_v23 = vmul.f32 %v1810_v20, %v874_v22  ;;  %969 = vmatpush.msra.mxu0 %v942_v54  ;;  %v1784_v22 = vld [vmem:[%s2661_s28] ss:$0 sm:$0xff] }
 0x46a   : > { %v876_v24 = vadd.f32 %v1810_v20, %v875_v23  ;;  %970 = vmatpush.msra.mxu0 %v941_v55 }
 0x46b   : > { %1641 = vmatmul.msk.f32.vlgmr.msrb.gmra.mxu2 %vm563_vm1, %v793_v60 }
 0x46c   : > { %v730_v62 = vpop.permute.xlu0 %729  ;;  %v2367_v25 = vsel %vm877_vm4, %v1810_v20, %v876_v24  ;;  %971 = vmatpush.msra.mxu0 %v940_v56 }
 0x46d   : > { %750 = vmatpush.msra.mxu3 %v730_v62 }
 0x46e   : > { %1638 = vmatmul.msk.f32.vlgmr.msra.gmra.mxu3 %vm563_vm1, %v728_v61  ;;  %v1783_v61 = vld [vmem:[%s2620_s10] ss:$0 sm:$0xff] }
 0x4e6   : > { %v687_v63 = vpop.f32.mrf.mxu2 }
 0x4e7   : > { %821 = vrot.lane.b32.xlu0 %v687_v63, %s2638_s30 }
 0x4ee   : > { %v817_v0 = vpop.f32.mrf.mxu2 }
 0x4ef   : > { %829 = vrot.lane.b32.xlu1 %v817_v0, %s2637_s23 }
 0x4f1   : > { %v752_v1 = vpop.f32.mrf.mxu3 }
 0x4f2   : > { %825 = vrot.lane.b32.xlu2 %v752_v1, %s2639_s18  ;;  %s1687_s18 = sshll.u32 %s2148_s15, 3  ;;  %s529_s15 = scalar_lea.vmem [#allocation10], %s2249_s17 }
 0x54c   : > { %v826_v9 = vpop.permute.xlu2 %825 }
 0x559   : > { %v822_v7 = vpop.permute.xlu0 %821 }
 0x55a   : > { %v832_v8 = vsel %vm563_vm1, %v2326_v30, %v822_v7  ;;  %v911_v30 = vld [vmem:[%s2617_s7 + $0x18] sm:$0xff] }
 0x55b   : > { %v834_v10 = vsel %vm833_vm2, %v832_v8, %v826_v9  ;;  %931 = vmatpush.msrb.mxu3 %v911_v30  ;;  %v1648_v8 = vld [vmem:[%s2612_s2 + $0x38] sm:$0xff]  ;;  %v1647_v9 = vld [vmem:[%s2612_s2 + $0x30] sm:$0xff] }
 0x55c   : > { %1029 = vmatpush.msra.mxu2 %v1648_v8 }
 0x55d   : > { %932 = vmatpush.msrb.mxu3 %v910_v31 }
 0x55e   : > { %1030 = vmatpush.msra.mxu2 %v1647_v9 }
 0x55f   : > { %933 = vmatpush.msrb.mxu3 %v909_v32 }
 0x561   : > { %v830_v11 = vpop.permute.xlu1 %829  ;;  %934 = vmatpush.msrb.mxu3 %v908_v33 }
 0x562   : > { %v836_v12 = vsel %vm835_vm3, %v834_v10, %v830_v11  ;;  %v1646_v10 = vld [vmem:[%s2612_s2 + $0x28] sm:$0xff]  ;;  %v1645_v11 = vld [vmem:[%s2612_s2 + $0x20] sm:$0xff] }
 0x563   : > { %1642 = vmatmul.msk.f32.vlgmr.msra.gmra.mxu1 %vm536_vm0, %v836_v12  ;;  %1031 = vmatpush.msra.mxu2 %v1646_v10 }
 0x565   : > { %1032 = vmatpush.msra.mxu2 %v1645_v11 }
 0x5e0   : > { %v865_v15 = vpop.f32.mrf.mxu1 }
 0x5e1   : > { %v866_v16 = vadd.f32 %v1779_v14, %v865_v15 }
 0x5e3   : > { %v868_v17 = vadd.f32 %v866_v16, %v2283_v4 }
 0x5e5   : > { %v869_v18 = vsel %vm536_vm0, %v868_v17, 0.0 }
 0x5e6   : > { %870 = vadd.xlane.f32.xlu0 %v869_v18 }
 0x659   : > { %v871_v26 = vpop.xlane.xlu0 %870 }
 0x65a   : > { %v879_v27 = vmul.f32 %v2367_v25, %v871_v26  ;;  %v1785_v26 = vld [vmem:[%s2663_s14] ss:$0 sm:$0xff] }
 0x65c   : > { %v880_v28 = vsub.f32 %v868_v17, %v879_v27 }
 0x65e   : > { %v881_v29 = vmul.f32 %v880_v28, %v880_v28 }
 0x660   : > { %v882_v4 = vsel %vm536_vm0, %v881_v29, 0.0 }
 0x661   : > { %883 = vadd.xlane.f32.xlu2 %v882_v4 }
 0x6d4   : > { %v884_v37 = vpop.xlane.xlu2 %883 }
 0x6d5   : > { %v885_v38 = vmul.f32 %v884_v37, %v2367_v25 }
 0x6d7   : > { %v886_v40 = vadd.f32 1e-05, %v885_v38 }
 0x6d9   : > { %1811 = vrsqrt.f32 %v886_v40  ;;  %vm893_vm6 = vweird.f32 %v886_v40 }
 0x6df   : > { %v1812_v42 = vpop.eup %1811 }
 0x6e0   : > { %v888_v43 = vmul.f32 %v1812_v42, %v886_v40  ;;  %vm894_vm5 = vweird.f32 %v1812_v42 }
 0x6e1   : > { %vm895_vm7 = vmor %vm893_vm6, %vm894_vm5 }
 0x6e2   : > { %v889_v44 = vmul.f32 %v1812_v42, %v888_v43 }
 0x6e4   : > { %v890_v45 = vmul.f32 0.5, %v889_v44 }
 0x6e6   : > { %v891_v46 = vsub.f32 1.5, %v890_v45 }
 0x6e8   : > { %v892_v47 = vmul.f32 %v1812_v42, %v891_v46 }
 0x6ea   : > { %v896_v49 = vsel %vm895_vm7, %v1812_v42, %v892_v47 }
 0x6eb   : > { %v897_v50 = vmul.f32 %v896_v49, %v880_v28 }
 0x6ed   : > { %v902_v52 = vmul.f32 %v1780_v48, %v897_v50 }
 0x6ef   : > { %v907_v53 = vadd.f32 %v1781_v51, %v902_v52 }
 0x6f1   : > { %1643 = vmatmul.msk.f32.vlgmr.msrb.gmra.mxu3 %vm536_vm0, %v907_v53 }
 0x774   : > { %v936_v58 = vpop.f32.mrf.mxu3 }
 0x775   : > { %v937_v59 = vadd.f32 %v1782_v57, %v936_v58 }
 0x777   : > { %v939_v60 = vmax.f32 %v937_v59, 0.0 }
 0x779   : > { %1644 = vmatmul.msk.f32.vlgmr.msra.gmra.mxu0 %vm952_vm8, %v939_v60 }
 0x7f6   : > { %v973_v62 = vpop.f32.mrf.mxu0 }
 0x7f7   : > { %v974_v63 = vadd.f32 %v1783_v61, %v973_v62 }
 0x7f9   : > { %v976_v0 = vadd.f32 %v974_v63, %v907_v53 }
 0x7fb   : > { %v977_v1 = vsel %vm536_vm0, %v976_v0, 0.0 }
 0x7fc   : > { %978 = vadd.xlane.f32.xlu1 %v977_v1 }
 0x86f   : > { %v979_v2 = vpop.xlane.xlu1 %978 }
 0x870   : > { %v980_v3 = vmul.f32 %v979_v2, %v2367_v25 }
 0x872   : > { %v981_v5 = vsub.f32 %v976_v0, %v980_v3 }
 0x874   : > { %v982_v6 = vmul.f32 %v981_v5, %v981_v5 }
 0x876   : > { %v983_v7 = vsel %vm536_vm0, %v982_v6, 0.0 }
 0x877   : > { %984 = vadd.xlane.f32.xlu0 %v983_v7 }
 0x8ea   : > { %v985_v12 = vpop.xlane.xlu0 %984 }
 0x8eb   : > { %v986_v14 = vmul.f32 %v985_v12, %v2367_v25 }
 0x8ed   : > { %v987_v15 = vadd.f32 1e-05, %v986_v14 }
 0x8ef   : > { %1813 = vrsqrt.f32 %v987_v15  ;;  %vm994_vm10 = vweird.f32 %v987_v15 }
 0x8f5   : > { %v1814_v16 = vpop.eup %1813 }
 0x8f6   : > { %v989_v17 = vmul.f32 %v1814_v16, %v987_v15  ;;  %vm995_vm9 = vweird.f32 %v1814_v16 }
 0x8f7   : > { %vm996_vm11 = vmor %vm994_vm10, %vm995_vm9 }
 0x8f8   : > { %v990_v18 = vmul.f32 %v1814_v16, %v989_v17 }
 0x8fa   : > { %v991_v19 = vmul.f32 0.5, %v990_v18 }
 0x8fc   : > { %v992_v20 = vsub.f32 1.5, %v991_v19 }
 0x8fe   : > { %v993_v21 = vmul.f32 %v1814_v16, %v992_v20 }
 0x900   : > { %v997_v23 = vsel %vm996_vm11, %v1814_v16, %v993_v21 }
 0x901   : > { %v998_v24 = vmul.f32 %v997_v23, %v981_v5 }
 0x903   : > { %v1003_v27 = vmul.f32 %v1784_v22, %v998_v24 }
 0x905   : > { %v2438_v28 = vadd.f32 %v1785_v26, %v1003_v27  ;;  %v1665_v26 = vld [vmem:[%s2613_s3 + $0x38] sm:$0xff]  ;;  %v1664_v27 = vld [vmem:[%s2613_s3 + $0x30] sm:$0xff] }
 0x907   : > { %1649 = vmatmul.msk.f32.vlgmr.msra.gmra.mxu2 %vm536_vm0, %v2438_v28 }
 0x98a   : > { %v2442_v29 = vpop.f32.mrf.mxu2 }
 0x98b   : > { %1075 = vrot.lane.b32.xlu0 %v2442_v29, %s2040_s20  ;;  %1038 = vrot.lane.b32.xlu2 %v2442_v29, %s2041_s22  ;;  %s2665_s20 = smov 48   ;;  %s2666_s22 = smov 40  }
 0x993   : > { %1101 = vrot.lane.b32.xlu2 %v2442_v29, %s2042_s25  ;;  %s2667_s25 = smov 8  }
 0x99b   : > { %1168 = vrot.lane.b32.xlu2 %v2442_v29, %s2043_s12  ;;  %s2668_s12 = smov 24  }
 0x9a3   : > { %1231 = vrot.lane.b32.xlu2 %v2442_v29, %s2046_s27 }
 0x9e5   : > { %v1039_v4 = vpop.permute.xlu2 %1038 }
 0x9e6   : > { %1650 = vmatpush.xpose.msk.msrb.mxu1 %vm563_vm1, %v1039_v4  ;;  %v1662_v4 = vld [vmem:[%s2613_s3 + $0x20] sm:$0xff] }
 0x9e9   : > { %1651 = vmatmul.msk.f32.vlgmr.msrb.gmra.mxu1 %vm563_vm1, %v2442_v29 }
 0x9ed   : > { %v1102_v30 = vpop.permute.xlu2 %1101 }
 0x9f5   : > { %v1169_v32 = vpop.permute.xlu2 %1168 }
 0x9fd   : > { %v1076_v31 = vpop.permute.xlu0 %1075  ;;  %v1232_v47 = vpop.permute.xlu2 %1231 }
 0x9fe   : > { %1096 = vmatpush.msra.mxu3 %v1076_v31 }
 0xa00   : > { %1656 = vmatpush.xpose.msk.msrb.mxu3 %vm563_vm1, %v1169_v32 }
 0xa66   : > { %v1061_v33 = vpop.f32.mrf.mxu1 }
 0xa67   : > { %v1062_v34 = vadd.f32 %v1061_v33, %v2312_v13 }
 0xa69   : > { %v1064_v35 = vsel %vm563_vm1, %v1062_v34, -inf }
 0xa6a   : > { %1065 = vmax.xlane.f32.xlu1 %v1064_v35 }
 0xa83   : > { %1103 = vrot.lane.b32.xlu1 %v2442_v29, %s2039_s19  ;;  %s2664_s19 = smov 56  }
 0xa8b   : > { %1166 = vrot.lane.b32.xlu1 %v2442_v29, %s2045_s11  ;;  %s1499_s11 = sshll.u32 %s529_s15, 4  ;;  %s1500_s11 = int_to_ptr.vmem [resolvable:$true] %s1499_s11 }
 0xadd   : > { %v1066_v36 = vpop.xlane.xlu1 %1065 }
 0xade   : > { %v1067_v37 = vsub.f32 %v1062_v34, %v1066_v36  ;;  %v1786_v36 = vld [vmem:[%s2614_s4 + $0x1] ss:$0 sm:$0xff] }
 0xae0   : > { %v1068_v38 = vmul.f32 1.442695, %v1067_v37 }
 0xae2   : > { %1815 = vpow2.f32 %v1068_v38 }
 0xae8   : > { %v1816_v39 = vpop.eup %1815 }
 0xae9   : > { %v1070_v40 = vsel %vm563_vm1, %v1816_v39, 0.0 }
 0xaea   : > { %1071 = vadd.xlane.f32.xlu0 %v1070_v40 }
 0xaf5   : > { %v1104_v41 = vpop.permute.xlu1 %1103 }
 0xaf6   : > { %1653 = vmatpush.xpose.msk.msrb.mxu2 %vm563_vm1, %v1104_v41 }
 0xaf9   : > { %1654 = vmatmul.msk.f32.vlgmr.msrb.gmra.mxu2 %vm563_vm1, %v1102_v30 }
 0xafd   : > { %v1167_v45 = vpop.permute.xlu1 %1166 }
 0xafe   : > { %1233 = vrot.lane.b32.xlu0 %v2442_v29, %s2044_s21  ;;  %s2669_s21 = smov 16  }
 0xb5d   : > { %v1072_v42 = vpop.xlane.xlu0 %1071 }
 0xb5e   : > { %1817 = vrcp.f32 %v1072_v42 }
 0xb64   : > { %v1818_v43 = vpop.eup %1817 }
 0xb65   : > { %v1074_v44 = vmul.f32 %v1818_v43, %v1816_v39 }
 0xb67   : > { %1652 = vmatmul.msk.f32.vlgmr.msra.gmra.mxu3 %vm563_vm1, %v1074_v44 }
 0xb68   : > { %1336 = vmatpush.msra.mxu3 %v1665_v26 }
 0xb6a   : > { %1337 = vmatpush.msra.mxu3 %v1664_v27 }
 0xb6f   : > { %1657 = vmatmul.msk.f32.vlgmr.msrb.gmra.mxu3 %vm563_vm1, %v1167_v45 }
 0xb70   : > { %v1234_v46 = vpop.permute.xlu0 %1233 }
 0xb71   : > { %1659 = vmatpush.xpose.msk.msra.mxu2 %vm563_vm1, %v1234_v46  ;;  %v1672_v46 = vld [vmem:[%s2617_s7 + $0x38] sm:$0xff] }
 0xb74   : > { %1660 = vmatmul.msk.f32.vlgmr.msra.gmra.mxu2 %vm563_vm1, %v1232_v47  ;;  %v1670_v47 = vld [vmem:[%s2617_s7 + $0x28] sm:$0xff] }
 0xb7c   : > { %v1126_v48 = vpop.f32.mrf.mxu2 }
 0xb7d   : > { %v1127_v49 = vadd.f32 %v1126_v48, %v2312_v13  ;;  %v1669_v48 = vld [vmem:[%s2617_s7 + $0x20] sm:$0xff] }
 0xb7f   : > { %v1129_v50 = vsel %vm563_vm1, %v1127_v49, -inf }
 0xb80   : > { %1130 = vmax.xlane.f32.xlu0 %v1129_v50  ;;  %v1680_v50 = vld [vmem:[%s2619_s9 + $0x70] sm:$0xff] }
 0xbea   : > { %v2475_v51 = vpop.f32.mrf.mxu3 }
 0xbf2   : > { %v1191_v52 = vpop.f32.mrf.mxu3 }
 0xbf3   : > { %v1192_v53 = vadd.f32 %v1191_v52, %v2312_v13  ;;  %v1131_v54 = vpop.xlane.xlu0 %1130 }
 0xbf4   : > { %v1132_v55 = vsub.f32 %v1127_v49, %v1131_v54  ;;  %v1681_v49 = vld [vmem:[%s2619_s9 + $0x78] sm:$0xff]  ;;  %v1678_v54 = vld [vmem:[%s2619_s9 + $0x60] sm:$0xff] }
 0xbf5   : > { %v1194_v56 = vsel %vm563_vm1, %v1192_v53, -inf  ;;  %1438 = vmatpush.msrb.mxu2 %v1681_v49 }
 0xbf6   : > { %v1133_v57 = vmul.f32 1.442695, %v1132_v55  ;;  %1195 = vmax.xlane.f32.xlu1 %v1194_v56  ;;  %v1677_v56 = vld [vmem:[%s2619_s9 + $0x58] sm:$0xff] }
 0xbf7   : > { %v1256_v58 = vpop.f32.mrf.mxu2  ;;  %1439 = vmatpush.msrb.mxu2 %v1680_v50 }
 0xbf8   : > { %1819 = vpow2.f32 %v1133_v57  ;;  %v1257_v59 = vadd.f32 %v1256_v58, %v2312_v13 }
 0xbfa   : > { %v1259_v60 = vsel %vm563_vm1, %v1257_v59, -inf }
 0xbfb   : > { %1260 = vmax.xlane.f32.xlu2 %v1259_v60 }
 0xbfe   : > { %v1820_v61 = vpop.eup %1819 }
 0xbff   : > { %v1135_v62 = vsel %vm563_vm1, %v1820_v61, 0.0 }
 0xc00   : > { %1136 = vadd.xlane.f32.xlu0 %v1135_v62 }
 0xc14   : > { %1140 = vrot.lane.b32.xlu0 %v2442_v29, %s2664_s19 }
 0xc69   : > { %v1196_v63 = vpop.xlane.xlu1 %1195 }
 0xc6a   : > { %v1197_v0 = vsub.f32 %v1192_v53, %v1196_v63  ;;  %v1787_v63 = vld [vmem:[#allocation7 + $0x1] ss:$0 sm:$0xff] }
 0xc6c   : > { %v1198_v1 = vmul.f32 1.442695, %v1197_v0 }
 0xc6e   : > { %1821 = vpow2.f32 %v1198_v1  ;;  %v1261_v2 = vpop.xlane.xlu2 %1260 }
 0xc6f   : > { %v1262_v3 = vsub.f32 %v1257_v59, %v1261_v2  ;;  %v1788_v2 = vld [vmem:[%s2616_s6 + $0x1] ss:$0 sm:$0xff] }
 0xc71   : > { %v1263_v5 = vmul.f32 1.442695, %v1262_v3 }
 0xc73   : > { %1823 = vpow2.f32 %v1263_v5  ;;  %v1137_v8 = vpop.xlane.xlu0 %1136 }
 0xc74   : > { %v1822_v6 = vpop.eup %1821  ;;  %1825 = vrcp.f32 %v1137_v8  ;;  %v1789_v8 = vld [vmem:[#allocation8 + $0x1] ss:$0 sm:$0xff] }
 0xc75   : > { %v1200_v13 = vsel %vm563_vm1, %v1822_v6, 0.0 }
 0xc76   : > { %1201 = vadd.xlane.f32.xlu1 %v1200_v13  ;;  %v1675_v13 = vld [vmem:[%s2619_s9 + $0x48] sm:$0xff] }
 0xc79   : > { %v1824_v7 = vpop.eup %1823 }
 0xc7a   : > { %v1265_v9 = vsel %vm563_vm1, %v1824_v7, 0.0  ;;  %v1826_v10 = vpop.eup %1825 }
 0xc7b   : > { %1266 = vadd.xlane.f32.xlu2 %v1265_v9  ;;  %v1139_v11 = vmul.f32 %v1826_v10, %v1820_v61 }
 0xc86   : > { %v1141_v12 = vpop.permute.xlu0 %1140 }
 0xc87   : > { %1161 = vmatpush.msra.mxu1 %v1141_v12  ;;  %v1790_v12 = vld [vmem:[%s2620_s10 + $0x1] ss:$0 sm:$0xff] }
 0xc88   : > { %1655 = vmatmul.msk.f32.vlgmr.msra.gmra.mxu1 %vm563_vm1, %v1139_v11 }
 0xc8f   : > { %1205 = vrot.lane.b32.xlu1 %v2442_v29, %s2665_s20  ;;  %s2670_s20 = sld [smem:[#allocation27_spill]] }
 0xc93   : > { %1270 = vrot.lane.b32.xlu2 %v2442_v29, %s2666_s22  ;;  %v1663_v29 = vld [vmem:[%s2613_s3 + $0x28] sm:$0xff] }
 0xc94   : > { %1338 = vmatpush.msra.mxu3 %v1663_v29 }
 0xc95   : > { %s1497_s22 = scalar_lea.hbm %s2670_s20, %s1687_s18  ;;  %s1975_s17 = scalar_lea.hbm %s2670_s20, 16 }
 0xc96   : > { %1339 = vmatpush.msra.mxu3 %v1662_v4  ;;  %s1501_s27 = sshll.u32 %s1497_s22, 4  ;;  %s1502_s27 = int_to_ptr.hbm [resolvable:$true] %s1501_s27 }
 0xc97   : > { %s1969_s5 = sshra.s32 %s1502_s27, 4  ;;  %s1970_s5 = int_to_ptr.hbm [resolvable:$true] %s1969_s5 }
 0xc98   : > { %s1971_s8 = scalar_lea.hbm %s1970_s5, 8  ;;  %p1976_p7 = scmp.lt.s32.totalorder %s1970_s5, %s2670_s20 }
 0xc99   : > { %p1972_p1 = scmp.ne.s32.totalorder %s1970_s5, %s1971_s8  ;;  %p1977_p9 = scmp.lt.s32.totalorder %s1975_s17, %s1971_s8 }
 0xc9b   : > { %p1973_p3 = pnand %p1972_p1, %p2193_p4  ;;  %p1978_p8 = por %p1977_p9, %p1976_p7 }
 0xc9d   : > { %p1974_p12 = pneg %p1973_p3 }
 0xc9f   : > { %p1979_p10 = pnand %p1978_p8, %p1974_p12 }
 0xce9   : > { %v1202_v16 = vpop.xlane.xlu1 %1201 }
 0xcee   : > { %v1267_v14 = vpop.xlane.xlu2 %1266 }
 0xcef   : > { %1827 = vrcp.f32 %v1267_v14 }
 0xcf0   : > { %1829 = vrcp.f32 %v1202_v16 }
 0xcf5   : > { %v1828_v15 = vpop.eup %1827 }
 0xcf6   : > { %v1269_v17 = vmul.f32 %v1828_v15, %v1824_v7  ;;  %v1271_v18 = vpop.permute.xlu2 %1270  ;;  %v1830_v19 = vpop.eup %1829  ;;  %v1674_v7 = vld [vmem:[%s2619_s9 + $0x40] sm:$0xff] }
 0xcf7   : > { %1291 = vmatpush.msrb.mxu1 %v1271_v18  ;;  %v1204_v20 = vmul.f32 %v1830_v19, %v1822_v6  ;;  %v1676_v6 = vld [vmem:[%s2619_s9 + $0x50] sm:$0xff] }
 0xcf8   : > { %1661 = vmatmul.msk.f32.vlgmr.msrb.gmra.mxu1 %vm563_vm1, %v1269_v17 }
 0xd01   : > { %v1206_v21 = vpop.permute.xlu1 %1205 }
 0xd02   : > { %1226 = vmatpush.msrb.mxu0 %v1206_v21 }
 0xd03   : > { %1658 = vmatmul.msk.f32.vlgmr.msrb.gmra.mxu0 %vm563_vm1, %v1204_v20 }
 0xd04   : > { %1404 = vmatpush.msra.mxu0 %v1672_v46 }
 0xd05   : > { %v1163_v22 = vpop.f32.mrf.mxu1 }
 0xd06   : > { %1297 = vrot.lane.b32.xlu0 %v1163_v22, %s2667_s25 }
 0xd75   : > { %v1293_v23 = vpop.f32.mrf.mxu1 }
 0xd76   : > { %1305 = vrot.lane.b32.xlu1 %v1293_v23, %s2668_s12 }
 0xd78   : > { %v1298_v30 = vpop.permute.xlu0 %1297 }
 0xd79   : > { %v1308_v31 = vsel %vm563_vm1, %v2475_v51, %v1298_v30  ;;  %v1679_v51 = vld [vmem:[%s2619_s9 + $0x68] sm:$0xff] }
 0xd7a   : > { %1440 = vmatpush.msrb.mxu2 %v1679_v51 }
 0xd7c   : > { %1441 = vmatpush.msrb.mxu2 %v1678_v54 }
 0xd7e   : > { %1442 = vmatpush.msrb.mxu2 %v1677_v56 }
 0xd80   : > { %v1228_v24 = vpop.f32.mrf.mxu0  ;;  %1443 = vmatpush.msrb.mxu2 %v1676_v6 }
 0xd81   : > { %1301 = vrot.lane.b32.xlu0 %v1228_v24, %s2669_s21 }
 0xd82   : > { %1444 = vmatpush.msrb.mxu2 %v1675_v13 }
 0xd84   : > { %1445 = vmatpush.msrb.mxu2 %v1674_v7 }
 0xde8   : > { %v1306_v33 = vpop.permute.xlu1 %1305 }
 0xdf3   : > { %v1302_v32 = vpop.permute.xlu0 %1301 }
 0xdf4   : > { %v1309_v34 = vsel %vm833_vm2, %v1308_v31, %v1302_v32 }
 0xdf5   : > { %v1310_v35 = vsel %vm835_vm3, %v1309_v34, %v1306_v33  ;;  %v1791_v33 = vld [vmem:[%s2662_s24 + $0x1] ss:$0 sm:$0xff] }
 0xdf6   : > { %1667 = vmatmul.msk.f32.vlgmr.msra.gmra.mxu3 %vm536_vm0, %v1310_v35  ;;  %v1792_v35 = vld [vmem:[%s2663_s14 + $0x1] ss:$0 sm:$0xff] }
 0xe79   : > { %v1341_v37 = vpop.f32.mrf.mxu3 }
 0xe7a   : > { %v1342_v38 = vadd.f32 %v1786_v36, %v1341_v37 }
 0xe7c   : > { %v1344_v39 = vadd.f32 %v1342_v38, %v2438_v28  ;;  %v1671_v28 = vld [vmem:[%s2617_s7 + $0x30] sm:$0xff] }
 0xe7d   : > { %1405 = vmatpush.msra.mxu0 %v1671_v28 }
 0xe7e   : > { %v1345_v40 = vsel %vm536_vm0, %v1344_v39, 0.0 }
 0xe7f   : > { %1346 = vadd.xlane.f32.xlu2 %v1345_v40  ;;  %1406 = vmatpush.msra.mxu0 %v1670_v47 }
 0xe81   : > { %1407 = vmatpush.msra.mxu0 %v1669_v48 }
 0xef2   : > { %v1347_v41 = vpop.xlane.xlu2 %1346 }
 0xef3   : > { %v1348_v42 = vmul.f32 %v1347_v41, %v2367_v25 }
 0xef5   : > { %v1349_v43 = vsub.f32 %v1344_v39, %v1348_v42 }
 0xef7   : > { %v1350_v44 = vmul.f32 %v1349_v43, %v1349_v43 }
 0xef9   : > { %v1351_v45 = vsel %vm536_vm0, %v1350_v44, 0.0 }
 0xefa   : > { %1352 = vadd.xlane.f32.xlu0 %v1351_v45 }
 0xf6d   : > { %v1353_v52 = vpop.xlane.xlu0 %1352 }
 0xf6e   : > { %v1354_v53 = vmul.f32 %v1353_v52, %v2367_v25 }
 0xf70   : > { %v1355_v55 = vadd.f32 1e-05, %v1354_v53 }
 0xf72   : > { %1831 = vrsqrt.f32 %v1355_v55  ;;  %vm1362_vm13 = vweird.f32 %v1355_v55 }
 0xf78   : > { %v1832_v57 = vpop.eup %1831 }
 0xf79   : > { %v1357_v58 = vmul.f32 %v1832_v57, %v1355_v55  ;;  %vm1363_vm12 = vweird.f32 %v1832_v57 }
 0xf7a   : > { %vm1364_vm14 = vmor %vm1362_vm13, %vm1363_vm12 }
 0xf7b   : > { %v1358_v59 = vmul.f32 %v1832_v57, %v1357_v58 }
 0xf7d   : > { %v1359_v60 = vmul.f32 0.5, %v1358_v59 }
 0xf7f   : > { %v1360_v61 = vsub.f32 1.5, %v1359_v60 }
 0xf81   : > { %v1361_v62 = vmul.f32 %v1832_v57, %v1360_v61 }
 0xf83   : > { %v1365_v0 = vsel %vm1364_vm14, %v1832_v57, %v1361_v62 }
 0xf84   : > { %v1366_v1 = vmul.f32 %v1365_v0, %v1349_v43 }
 0xf86   : > { %v1372_v3 = vmul.f32 %v1787_v63, %v1366_v1 }
 0xf88   : > { %v1378_v5 = vadd.f32 %v1788_v2, %v1372_v3 }
 0xf8a   : > { %1673 = vmatmul.msk.f32.vlgmr.msra.gmra.mxu0 %vm536_vm0, %v1378_v5 }
0x1007   : > { %v1409_v9 = vpop.f32.mrf.mxu0 }
0x1008   : > { %v1410_v10 = vadd.f32 %v1789_v8, %v1409_v9 }
0x100a   : > { %v1412_v11 = vmax.f32 %v1410_v10, 0.0 }
0x100c   : > { %1683 = vmatmul.msk.f32.vlgmr.msrb.gmra.mxu2 %vm952_vm8, %v1412_v11 }
0x108f   : > { %v1447_v14 = vpop.f32.mrf.mxu2 }
0x1090   : > { %v1448_v15 = vadd.f32 %v1790_v12, %v1447_v14 }
0x1092   : > { %v1450_v16 = vadd.f32 %v1448_v15, %v1378_v5 }
0x1094   : > { %v1451_v17 = vsel %vm536_vm0, %v1450_v16, 0.0 }
0x1095   : > { %1452 = vadd.xlane.f32.xlu1 %v1451_v17 }
0x1108   : > { %v1453_v18 = vpop.xlane.xlu1 %1452 }
0x1109   : > { %v1454_v19 = vmul.f32 %v1453_v18, %v2367_v25 }
0x110b   : > { %v1455_v20 = vsub.f32 %v1450_v16, %v1454_v19 }
0x110d   : > { %v1456_v21 = vmul.f32 %v1455_v20, %v1455_v20 }
0x110f   : > { %v1457_v22 = vsel %vm536_vm0, %v1456_v21, 0.0 }
0x1110   : > { %1458 = vadd.xlane.f32.xlu2 %v1457_v22 }
0x1183   : > { %v1459_v23 = vpop.xlane.xlu2 %1458 }
0x1184   : > { %v1460_v24 = vmul.f32 %v1459_v23, %v2367_v25 }
0x1186   : > { %v1461_v26 = vadd.f32 1e-05, %v1460_v24 }
0x1188   : > { %1833 = vrsqrt.f32 %v1461_v26  ;;  %vm1468_vm1 = vweird.f32 %v1461_v26 }
0x118e   : > { %v1834_v27 = vpop.eup %1833 }
0x118f   : > { %v1463_v29 = vmul.f32 %v1834_v27, %v1461_v26  ;;  %vm1469_vm15 = vweird.f32 %v1834_v27 }
0x1190   : > { %vm1470_vm2 = vmor %vm1468_vm1, %vm1469_vm15 }
0x1191   : > { %v1464_v4 = vmul.f32 %v1834_v27, %v1463_v29 }
0x1193   : > { %v1465_v30 = vmul.f32 0.5, %v1464_v4 }
0x1195   : > { %v1466_v31 = vsub.f32 1.5, %v1465_v30 }
0x1197   : > { %v1467_v32 = vmul.f32 %v1834_v27, %v1466_v31 }
0x1199   : > { %v1471_v25 = vsel %vm1470_vm2, %v1834_v27, %v1467_v32 }
0x119a   : > { %v1472_v34 = vmul.f32 %v1471_v25, %v1455_v20 }
0x119c   : > { %v1478_v36 = vmul.f32 %v1791_v33, %v1472_v34 }
0x119e   : > { %v1484_v37 = vadd.f32 %v1792_v35, %v1478_v36 }
0x11a0   : > { %1485 = vst.msk [vmem:[%s529_s15] sm:$0xff] %vm536_vm0, %v1484_v37 }
0x11a1   : > { %1982 = shalt.err (!%p1979_p10)
}
0x11a2   : > { %1702 = dma.vmem_to_hbm [thread:$0]  (%p2193_p4), %s1500_s11, 128, %s1502_s27, %s1487_s29  }
0x11a3 PF: > { %s2672_s13 = sld [smem:[#allocation16_spill]] }
0x11a4   : > { %s2674_s19 = sld [smem:[#allocation18_spill]] }
0x11a9   : > { %s1513_s22 = sand.u32 1, %s2672_s13  }
0x11aa   : > { %p2675_p11 = scmp.ge.s32.totalorder %s2674_s19, 2  ;;  %s1514_s12 = scalar_lea.sflag [#allocation4], %s1513_s22 }
0x11ac   : > { %p1719_p5 = pnand %p2675_p11, %p2197_p6 }
0x11ae   : > { %p1720_p13 = pneg %p1719_p5 }
0x11b0   : > { %2016 = dma.done.wait (%p1720_p13), %s1514_s12, 128  }
0x11b1   : > { %2018 = vsyncadd (%p1720_p13), %s1514_s12, 4294967168  ;;  %s2676_s28 = sld [smem:[#allocation19_spill]]  ;;  %s2679_s25 = smov %s2025_s26 }
0x11b2   : > { %s2677_s21 = sld [smem:[#allocation17_spill]] }
0x11b3   : > { %s2678_s27 = sld [smem:[#allocation20_spill]] }
0x11b7   : > { %p30_p0 = scmp.ge.s32.totalorder %s2676_s28, 4  }
0x11b8   : > { %s2680_s26 = smov %s2677_s21 }
0x11b9   :  { %32 = sbr.rel (!%p30_p0) target bundleno = 14 (0xe), region = 149 }
0x11be   :  { %1520 = vsyncpa [#allocation3], 1 }
0x11bf   :  { %1522 = vsyncpa [#allocation3 + $0x1], 1 }
0x11c0   :  { %1523 = vsyncpa [#allocation6], 1 }
0x11c1   :  { %1525 = vsyncpa [#allocation6 + $0x1], 1 }
0x11c2   :  { %1526 = vsyncpa [#allocation9], 1 }
0x11c3   :  { %1527 = vsyncpa [#allocation4], 1 }
0x11c4   :  { %1529 = vsyncpa [#allocation4 + $0x1], 1 }

</bundles_post_ra>
